<compile_context>
chip_gen: v7x
topology: tpu7x:2x2x1
jax: 0.10.0
libtpu: 0.0.40
codegen_flags: <defaults>
</compile_context>

<pallas_src>
import functools

import jax
import jax.numpy as jnp
from jax.experimental import pallas as pl
from jax.experimental.pallas import tpu as pltpu


CPAD = 128  # lane-dense padded channel width for the 64-channel edge features


def _tile_n(n, cap=512):
    """Largest tile of the point dim that divides N (keeps (8,128) rule)."""
    for t in (cap, 256, 128, 64, 32, 16, 8):
        if n % t == 0:
            return t
    return n  # fall back to the full dim (always legal as a block)


# ---------------------------------------------------------------------------
# Pallas kernels
# ---------------------------------------------------------------------------

def _conv_bn_relu_kernel(x_ref, w_ref, scale_ref, shift_ref, o_ref):
    # x_ref: (1, TN, Cin) bf16; w_ref: (Cin, Cout) bf16; scale/shift: (1, Cout) f32
    # out:   (1, TN, Cout) bf16 = relu(bn(x @ W))
    y = jnp.dot(x_ref[0], w_ref[...], preferred_element_type=jnp.float32)
    y = jnp.maximum(y * scale_ref[...] + shift_ref[...], 0.0)
    o_ref[0] = y.astype(o_ref.dtype)


def _conv5_globalmax_kernel(x_ref, w5_ref, s5_ref, b5_ref, w6hi_ref,
                            gpart_ref, mmax):
    # Per N-tile: y = relu(bn5(x @ W5)); running max over the N axis in a VMEM
    # scratch; on the last tile, emit g @ W6_hi (the global-feature half of
    # conv6's pre-BN activation), so the (B, N, 1088) concat never exists.
    nt = pl.program_id(1)

    @pl.when(nt == 0)
    def _():
        mmax[...] = jnp.full(mmax.shape, -jnp.inf, mmax.dtype)

    y = jnp.dot(x_ref[0], w5_ref[...], preferred_element_type=jnp.float32)
    y = jnp.maximum(y * s5_ref[...] + b5_ref[...], 0.0)          # (TN, 1024)
    mmax[...] = jnp.maximum(mmax[...], jnp.max(y, axis=0, keepdims=True))

    @pl.when(nt == pl.num_programs(1) - 1)
    def _():
        g = mmax[...].astype(w6hi_ref.dtype)                     # (1, 1024)
        gpart_ref[0] = jnp.dot(g, w6hi_ref[...],
                               preferred_element_type=jnp.float32)  # (1, 512)


def _tail_kernel(x1_ref, gpart_ref, w6_ref, s6_ref, b6_ref,
                 w7_ref, s7_ref, b7_ref, w8_ref, o_ref):
    # Fused conv6 -> conv7 -> conv8 for one (TN) point tile; all weights stay
    # resident in VMEM, only the final (TN, Cout) tile goes back to HBM.
    y = jnp.dot(x1_ref[0], w6_ref[...], preferred_element_type=jnp.float32)
    y = y + gpart_ref[0]                                   # + g @ W6_hi (f32)
    y = jnp.maximum(y * s6_ref[...] + b6_ref[...], 0.0)    # bn6 + relu
    y = jnp.dot(y.astype(w7_ref.dtype), w7_ref[...],
                preferred_element_type=jnp.float32)
    y = jnp.maximum(y * s7_ref[...] + b7_ref[...], 0.0)    # bn7 + relu
    y = jnp.dot(y.astype(w8_ref.dtype), w8_ref[...],
                preferred_element_type=jnp.float32)
    o_ref[0] = jnp.maximum(y, 0.0).astype(o_ref.dtype)     # conv8: relu only


# ---------------------------------------------------------------------------
# pallas_call wrappers
# ---------------------------------------------------------------------------

def conv_bn_relu(x, w, scale, shift):
    """x: (B, N, Cin) bf16 -> (B, N, Cout) bf16, relu(bn(x @ W))."""
    B, N, Cin = x.shape
    Cout = w.shape[1]
    TN = _tile_n(N)
    return pl.pallas_call(
        _conv_bn_relu_kernel,
        out_shape=jax.ShapeDtypeStruct((B, N, Cout), jnp.bfloat16),
        grid=(B, N // TN),
        in_specs=[
            pl.BlockSpec((1, TN, Cin), lambda b, n: (b, n, 0)),
            pl.BlockSpec((Cin, Cout), lambda b, n: (0, 0)),
            pl.BlockSpec((1, Cout), lambda b, n: (0, 0)),
            pl.BlockSpec((1, Cout), lambda b, n: (0, 0)),
        ],
        out_specs=pl.BlockSpec((1, TN, Cout), lambda b, n: (b, n, 0)),
        compiler_params=pltpu.CompilerParams(
            dimension_semantics=("parallel", "parallel")),
    )(x, w, scale, shift)


def conv5_global_w6hi(x, w5, s5, b5, w6hi):
    """x: (B, N, Cin) -> (B, 1, 512) f32: (max_N relu(bn5(x @ W5))) @ W6_hi."""
    B, N, Cin = x.shape
    C5 = w5.shape[1]
    C6 = w6hi.shape[1]
    TN = _tile_n(N)
    return pl.pallas_call(
        _conv5_globalmax_kernel,
        out_shape=jax.ShapeDtypeStruct((B, 1, C6), jnp.float32),
        grid=(B, N // TN),
        in_specs=[
            pl.BlockSpec((1, TN, Cin), lambda b, n: (b, n, 0)),
            pl.BlockSpec((Cin, C5), lambda b, n: (0, 0)),
            pl.BlockSpec((1, C5), lambda b, n: (0, 0)),
            pl.BlockSpec((1, C5), lambda b, n: (0, 0)),
            pl.BlockSpec((C5, C6), lambda b, n: (0, 0)),
        ],
        out_specs=pl.BlockSpec((1, 1, C6), lambda b, n: (b, 0, 0)),
        scratch_shapes=[pltpu.VMEM((1, C5), jnp.float32)],
        compiler_params=pltpu.CompilerParams(
            dimension_semantics=("parallel", "arbitrary")),
    )(x, w5, s5, b5, w6hi)


def fused_tail(x1, gpart, w6lo, s6, b6, w7, s7, b7, w8):
    """Fused conv6/conv7/conv8: (B, N, 128) + (B, 1, 512) -> (B, N, Cout) f32."""
    B, N, C1 = x1.shape
    C6 = w6lo.shape[1]
    C7 = w7.shape[1]
    Cout = w8.shape[1]
    TN = _tile_n(N)
    return pl.pallas_call(
        _tail_kernel,
        out_shape=jax.ShapeDtypeStruct((B, N, Cout), jnp.float32),
        grid=(B, N // TN),
        in_specs=[
            pl.BlockSpec((1, TN, C1), lambda b, n: (b, n, 0)),
            pl.BlockSpec((1, 1, C6), lambda b, n: (b, 0, 0)),
            pl.BlockSpec((C1, C6), lambda b, n: (0, 0)),
            pl.BlockSpec((1, C6), lambda b, n: (0, 0)),
            pl.BlockSpec((1, C6), lambda b, n: (0, 0)),
            pl.BlockSpec((C6, C7), lambda b, n: (0, 0)),
            pl.BlockSpec((1, C7), lambda b, n: (0, 0)),
            pl.BlockSpec((1, C7), lambda b, n: (0, 0)),
            pl.BlockSpec((C7, Cout), lambda b, n: (0, 0)),
        ],
        out_specs=pl.BlockSpec((1, TN, Cout), lambda b, n: (b, n, 0)),
        compiler_params=pltpu.CompilerParams(
            dimension_semantics=("parallel", "parallel")),
    )(x1, gpart, w6lo, s6, b6, w7, s7, b7, w8)


# ---------------------------------------------------------------------------
# Plain-JAX glue: kNN indices and neighbor-max reduction ("keep_feature")
# ---------------------------------------------------------------------------
# TODO(synk): tile the (B, N, N) pairwise-distance / top_k for large N
#             (Pallas kNN kernel) instead of materializing the full matrix.
# TODO(synk): fuse the neighbor gather+max into the edge-conv kernel via
#             scalar-prefetched indices / manual DMA gather to avoid the
#             XLA-materialized (B, N, K, C) intermediate.

def knn_indices(x, k):
    """x: (B, N, C) -> (B, N, k) indices of the k nearest points (incl. self)."""
    xf = x.astype(jnp.float32)
    inner = jnp.einsum('bnc,bmc->bnm', xf, xf)
    sq = jnp.sum(xf * xf, axis=-1)                        # (B, N)
    dist = sq[:, :, None] - 2.0 * inner + sq[:, None, :]
    _, idx = jax.lax.top_k(-dist, k)
    return idx


def neighbor_max(z, idx):
    """z: (B, N, C), idx: (B, N, K) -> (B, N, C) max over gathered neighbors.

    Because the conv is 1x1 and BN/ReLU are elementwise, max_j f(z[idx[n,j]])
    == the reference's max over the k-dim of f applied to gathered features.
    """
    gathered = jax.vmap(lambda zb, ib: zb[ib])(z, idx)    # (B, N, K, C)
    return jnp.max(gathered, axis=2)


# ---------------------------------------------------------------------------
# Parameters (deterministic, synthetic; BN folded to scale/shift)
# ---------------------------------------------------------------------------

def _conv_weight(key, cin, cout):
    return jax.random.normal(key, (cin, cout), jnp.float32) / jnp.sqrt(float(cin))


def _bn_scale_shift(key, c, eps=1e-5):
    k1, k2, k3, k4 = jax.random.split(key, 4)
    gamma = 1.0 + 0.1 * jax.random.normal(k1, (c,), jnp.float32)
    beta = 0.1 * jax.random.normal(k2, (c,), jnp.float32)
    running_mean = 0.1 * jax.random.normal(k3, (c,), jnp.float32)
    running_var = 1.0 + 0.1 * jax.random.uniform(k4, (c,), jnp.float32)
    scale = gamma / jnp.sqrt(running_var + eps)
    shift = beta - running_mean * scale
    return scale.reshape(1, c), shift.reshape(1, c)


def _pad_out(w, cpad):
    return jnp.pad(w, ((0, 0), (0, cpad - w.shape[1])))


def _pad_in(w, cpad):
    return jnp.pad(w, ((0, cpad - w.shape[0]), (0, 0)))


def _pad_vec(v, cpad):
    return jnp.pad(v, ((0, 0), (0, cpad - v.shape[1])))


def init_params(key, input_channel, output_channel):
    keys = jax.random.split(key, 16)
    bf = jnp.bfloat16
    p = {}

    # edge convs 1-4: true 64 channels, zero-padded to CPAD (=128) lanes.
    w1 = _pad_out(_conv_weight(keys[0], input_channel, 64), CPAD)
    s1, b1 = _bn_scale_shift(keys[1], 64)
    p['w1'] = w1.astype(bf)
    p['s1'], p['b1'] = _pad_vec(s1, CPAD), _pad_vec(b1, CPAD)

    for li, (kw, kb) in enumerate([(keys[2], keys[3]), (keys[4], keys[5]),
                                   (keys[6], keys[7])], start=2):
        w = _pad_in(_pad_out(_conv_weight(kw, 64, 64), CPAD), CPAD)
        s, b = _bn_scale_shift(kb, 64)
        p[f'w{li}'] = w.astype(bf)
        p[f's{li}'], p[f'b{li}'] = _pad_vec(s, CPAD), _pad_vec(b, CPAD)

    # conv5: 64 -> 1024 (input padded to 128 rows).
    p['w5'] = _pad_in(_conv_weight(keys[8], 64, 1024), CPAD).astype(bf)
    p['s5'], p['b5'] = _bn_scale_shift(keys[9], 1024)

    # conv6: 1088 -> 512, split into the x1 half (64 rows, padded) and the
    # global-feature half (1024 rows) so the concat is never built.
    w6 = _conv_weight(keys[10], 1088, 512)
    p['w6lo'] = _pad_in(w6[:64], CPAD).astype(bf)
    p['w6hi'] = w6[64:].astype(bf)
    p['s6'], p['b6'] = _bn_scale_shift(keys[11], 512)

    p['w7'] = _conv_weight(keys[12], 512, 128).astype(bf)
    p['s7'], p['b7'] = _bn_scale_shift(keys[13], 128)

    p['w8'] = _conv_weight(keys[14], 128, output_channel).astype(bf)  # no BN
    return p


# ---------------------------------------------------------------------------
# Forward pass (mirrors DGCNN_seg.forward)
# ---------------------------------------------------------------------------

@functools.partial(jax.jit, static_argnames=('k',))
def dgcnn_seg_forward(x_bcn, params, k=5):
    """x_bcn: (B, C, N) as in PyTorch.  Returns (B, output_channel, N)."""
    x = jnp.transpose(x_bcn, (0, 2, 1))                    # (B, N, C)
    x_bf = x.astype(jnp.bfloat16)

    # edge conv 1 (kNN on raw f32 input)
    idx = knn_indices(x, k)
    h = neighbor_max(conv_bn_relu(x_bf, params['w1'], params['s1'], params['b1']), idx)
    # edge conv 2
    idx = knn_indices(h, k)
    x1 = neighbor_max(conv_bn_relu(h, params['w2'], params['s2'], params['b2']), idx)
    # edge conv 3
    idx = knn_indices(x1, k)
    h = neighbor_max(conv_bn_relu(x1, params['w3'], params['s3'], params['b3']), idx)
    # edge conv 4
    idx = knn_indices(h, k)
    h = neighbor_max(conv_bn_relu(h, params['w4'], params['s4'], params['b4']), idx)

    # conv5 + global max over points, fused with the g @ W6_hi partial sum
    gpart = conv5_global_w6hi(h, params['w5'], params['s5'], params['b5'],
                              params['w6hi'])              # (B, 1, 512) f32

    # fused conv6 -> conv7 -> conv8 (concat replaced by split matmul)
    out = fused_tail(x1, gpart, params['w6lo'], params['s6'], params['b6'],
                     params['w7'], params['s7'], params['b7'], params['w8'])
    return jnp.transpose(out, (0, 2, 1))                   # (B, out_channel, N)


# ---------------------------------------------------------------------------
# main
# ---------------------------------------------------------------------------

if __name__ == "__main__":
    B, C_IN, N, K, C_OUT = 2, 4, 16, 5, 8
    key = jax.random.PRNGKey(0)
    k_x, k_p = jax.random.split(key)

    x = jax.random.normal(k_x, (B, C_IN, N), jnp.float32)   # PyTorch layout (B, C, N)
    params = init_params(k_p, C_IN, C_OUT)

    out = dgcnn_seg_forward(x, params, k=K)
    out = jax.block_until_ready(out)

    assert out.shape == (B, C_OUT, N), out.shape
    assert bool(jnp.all(jnp.isfinite(out)))
    assert bool(jnp.all(out >= 0.0))   # conv8 ends in ReLU per the reference
    print("KERNEL_OK")
</pallas_src>

<mosaic_0001>
module attributes {stable_mosaic.version = 11 : i64} {
  func.func @_conv_bn_relu_kernel(%arg0: i32, %arg1: i32, %arg2: memref<1x16x4xbf16, #tpu.memory_space<vmem>>, %arg3: memref<4x128xbf16, #tpu.memory_space<vmem>>, %arg4: memref<1x128xf32, #tpu.memory_space<vmem>>, %arg5: memref<1x128xf32, #tpu.memory_space<vmem>>, %arg6: memref<1x16x128xbf16, #tpu.memory_space<vmem>>) attributes {dimension_semantics = [#tpu.dimension_semantics<parallel>, #tpu.dimension_semantics<parallel>], iteration_bounds = array<i64: 2, 1>, scalar_prefetch = 0 : i64, scratch_operands = 0 : i64, tpu.core_type = #tpu.core_type<tc>, window_params = [{transform_indices = @transform_0, window_bounds = array<i64: 1, 16, 4>}, {pipeline_mode = #tpu.pipeline_mode<synchronous>, transform_indices = @transform_1, window_bounds = array<i64: 4, 128>}, {pipeline_mode = #tpu.pipeline_mode<synchronous>, transform_indices = @transform_2, window_bounds = array<i64: 1, 128>}, {pipeline_mode = #tpu.pipeline_mode<synchronous>, transform_indices = @transform_3, window_bounds = array<i64: 1, 128>}, {transform_indices = @transform_4, window_bounds = array<i64: 1, 16, 128>}]} {
    %c0 = arith.constant 0 : index
    %c0_0 = arith.constant 0 : index
    %c0_1 = arith.constant 0 : index
    %0 = vector.load %arg2[%c0, %c0_0, %c0_1] : memref<1x16x4xbf16, #tpu.memory_space<vmem>>, vector<1x16x4xbf16>
    %1 = vector.shape_cast %0 : vector<1x16x4xbf16> to vector<16x4xbf16>
    %c0_2 = arith.constant 0 : index
    %c0_3 = arith.constant 0 : index
    %2 = vector.load %arg3[%c0_2, %c0_3] : memref<4x128xbf16, #tpu.memory_space<vmem>>, vector<4x128xbf16>
    %cst = arith.constant dense<0.000000e+00> : vector<16x128xf32>
    %3 = tpu.matmul %1, %2, %cst {dimension_numbers = #tpu.dot_dimension_numbers<[1], [0], [0], [1], [0, 0, 1, 1], [], []>} : vector<16x4xbf16>, vector<4x128xbf16>, vector<16x128xf32> -> vector<16x128xf32>
    %c0_4 = arith.constant 0 : index
    %c0_5 = arith.constant 0 : index
    %4 = vector.load %arg4[%c0_4, %c0_5] : memref<1x128xf32, #tpu.memory_space<vmem>>, vector<1x128xf32>
    %5 = vector.broadcast %4 : vector<1x128xf32> to vector<16x128xf32>
    %6 = arith.mulf %3, %5 : vector<16x128xf32>
    %c0_6 = arith.constant 0 : index
    %c0_7 = arith.constant 0 : index
    %7 = vector.load %arg5[%c0_6, %c0_7] : memref<1x128xf32, #tpu.memory_space<vmem>>, vector<1x128xf32>
    %8 = vector.broadcast %7 : vector<1x128xf32> to vector<16x128xf32>
    %9 = arith.addf %6, %8 : vector<16x128xf32>
    %cst_8 = arith.constant 0.000000e+00 : f32
    %10 = vector.broadcast %cst_8 : f32 to vector<16x128xf32>
    %11 = arith.maximumf %9, %10 : vector<16x128xf32>
    %12 = arith.truncf %11 : vector<16x128xf32> to vector<16x128xbf16>
    %c0_9 = arith.constant 0 : index
    %c0_10 = arith.constant 0 : index
    %c0_11 = arith.constant 0 : index
    %13 = vector.load %arg6[%c0_9, %c0_10, %c0_11] : memref<1x16x128xbf16, #tpu.memory_space<vmem>>, vector<1x16x128xbf16>
    %14 = vector.shape_cast %13 : vector<1x16x128xbf16> to vector<16x128xbf16>
    %15 = vector.shape_cast %12 : vector<16x128xbf16> to vector<1x16x128xbf16>
    tpu.vector_store %arg6[%c0_9, %c0_10, %c0_11], %15 {strides = array<i32>} : memref<1x16x128xbf16, #tpu.memory_space<vmem>>, vector<1x16x128xbf16>,
    return
  }
  func.func @transform_0(%arg0: i32, %arg1: i32) -> (i32, i32, i32) {
    %c0_i32 = arith.constant 0 : i32
    %c0_i32_0 = arith.constant 0 : i32
    return %arg0, %arg1, %c0_i32 : i32, i32, i32
  }
  func.func @transform_1(%arg0: i32, %arg1: i32) -> (i32, i32) {
    %c0_i32 = arith.constant 0 : i32
    %c0_i32_0 = arith.constant 0 : i32
    %c0_i32_1 = arith.constant 0 : i32
    return %c0_i32, %c0_i32_0 : i32, i32
  }
  func.func @transform_2(%arg0: i32, %arg1: i32) -> (i32, i32) {
    %c0_i32 = arith.constant 0 : i32
    %c0_i32_0 = arith.constant 0 : i32
    %c0_i32_1 = arith.constant 0 : i32
    return %c0_i32, %c0_i32_0 : i32, i32
  }
  func.func @transform_3(%arg0: i32, %arg1: i32) -> (i32, i32) {
    %c0_i32 = arith.constant 0 : i32
    %c0_i32_0 = arith.constant 0 : i32
    %c0_i32_1 = arith.constant 0 : i32
    return %c0_i32, %c0_i32_0 : i32, i32
  }
  func.func @transform_4(%arg0: i32, %arg1: i32) -> (i32, i32, i32) {
    %c0_i32 = arith.constant 0 : i32
    %c0_i32_0 = arith.constant 0 : i32
    return %arg0, %arg1, %c0_i32 : i32, i32, i32
  }
}

module attributes {stable_mosaic.version = 11 : i64} {
  func.func @_conv_bn_relu_kernel(%arg0: i32, %arg1: i32, %arg2: memref<1x16x128xbf16, #tpu.memory_space<vmem>>, %arg3: memref<128x128xbf16, #tpu.memory_space<vmem>>, %arg4: memref<1x128xf32, #tpu.memory_space<vmem>>, %arg5: memref<1x128xf32, #tpu.memory_space<vmem>>, %arg6: memref<1x16x128xbf16, #tpu.memory_space<vmem>>) attributes {dimension_semantics = [#tpu.dimension_semantics<parallel>, #tpu.dimension_semantics<parallel>], iteration_bounds = array<i64: 2, 1>, scalar_prefetch = 0 : i64, scratch_operands = 0 : i64, tpu.core_type = #tpu.core_type<tc>, window_params = [{transform_indices = @transform_0, window_bounds = array<i64: 1, 16, 128>}, {pipeline_mode = #tpu.pipeline_mode<synchronous>, transform_indices = @transform_1, window_bounds = array<i64: 128, 128>}, {pipeline_mode = #tpu.pipeline_mode<synchronous>, transform_indices = @transform_2, window_bounds = array<i64: 1, 128>}, {pipeline_mode = #tpu.pipeline_mode<synchronous>, transform_indices = @transform_3, window_bounds = array<i64: 1, 128>}, {transform_indices = @transform_4, window_bounds = array<i64: 1, 16, 128>}]} {
    %c0 = arith.constant 0 : index
    %c0_0 = arith.constant 0 : index
    %c0_1 = arith.constant 0 : index
    %0 = vector.load %arg2[%c0, %c0_0, %c0_1] : memref<1x16x128xbf16, #tpu.memory_space<vmem>>, vector<1x16x128xbf16>
    %1 = vector.shape_cast %0 : vector<1x16x128xbf16> to vector<16x128xbf16>
    %c0_2 = arith.constant 0 : index
    %c0_3 = arith.constant 0 : index
    %2 = vector.load %arg3[%c0_2, %c0_3] : memref<128x128xbf16, #tpu.memory_space<vmem>>, vector<128x128xbf16>
    %cst = arith.constant dense<0.000000e+00> : vector<16x128xf32>
    %3 = tpu.matmul %1, %2, %cst {dimension_numbers = #tpu.dot_dimension_numbers<[1], [0], [0], [1], [0, 0, 1, 1], [], []>} : vector<16x128xbf16>, vector<128x128xbf16>, vector<16x128xf32> -> vector<16x128xf32>
    %c0_4 = arith.constant 0 : index
    %c0_5 = arith.constant 0 : index
    %4 = vector.load %arg4[%c0_4, %c0_5] : memref<1x128xf32, #tpu.memory_space<vmem>>, vector<1x128xf32>
    %5 = vector.broadcast %4 : vector<1x128xf32> to vector<16x128xf32>
    %6 = arith.mulf %3, %5 : vector<16x128xf32>
    %c0_6 = arith.constant 0 : index
    %c0_7 = arith.constant 0 : index
    %7 = vector.load %arg5[%c0_6, %c0_7] : memref<1x128xf32, #tpu.memory_space<vmem>>, vector<1x128xf32>
    %8 = vector.broadcast %7 : vector<1x128xf32> to vector<16x128xf32>
    %9 = arith.addf %6, %8 : vector<16x128xf32>
    %cst_8 = arith.constant 0.000000e+00 : f32
    %10 = vector.broadcast %cst_8 : f32 to vector<16x128xf32>
    %11 = arith.maximumf %9, %10 : vector<16x128xf32>
    %12 = arith.truncf %11 : vector<16x128xf32> to vector<16x128xbf16>
    %c0_9 = arith.constant 0 : index
    %c0_10 = arith.constant 0 : index
    %c0_11 = arith.constant 0 : index
    %13 = vector.load %arg6[%c0_9, %c0_10, %c0_11] : memref<1x16x128xbf16, #tpu.memory_space<vmem>>, vector<1x16x128xbf16>
    %14 = vector.shape_cast %13 : vector<1x16x128xbf16> to vector<16x128xbf16>
    %15 = vector.shape_cast %12 : vector<16x128xbf16> to vector<1x16x128xbf16>
    tpu.vector_store %arg6[%c0_9, %c0_10, %c0_11], %15 {strides = array<i32>} : memref<1x16x128xbf16, #tpu.memory_space<vmem>>, vector<1x16x128xbf16>,
    return
  }
  func.func @transform_0(%arg0: i32, %arg1: i32) -> (i32, i32, i32) {
    %c0_i32 = arith.constant 0 : i32
    %c0_i32_0 = arith.constant 0 : i32
    return %arg0, %arg1, %c0_i32 : i32, i32, i32
  }
  func.func @transform_1(%arg0: i32, %arg1: i32) -> (i32, i32) {
    %c0_i32 = arith.constant 0 : i32
    %c0_i32_0 = arith.constant 0 : i32
    %c0_i32_1 = arith.constant 0 : i32
    return %c0_i32, %c0_i32_0 : i32, i32
  }
  func.func @transform_2(%arg0: i32, %arg1: i32) -> (i32, i32) {
    %c0_i32 = arith.constant 0 : i32
    %c0_i32_0 = arith.constant 0 : i32
    %c0_i32_1 = arith.constant 0 : i32
    return %c0_i32, %c0_i32_0 : i32, i32
  }
  func.func @transform_3(%arg0: i32, %arg1: i32) -> (i32, i32) {
    %c0_i32 = arith.constant 0 : i32
    %c0_i32_0 = arith.constant 0 : i32
    %c0_i32_1 = arith.constant 0 : i32
    return %c0_i32, %c0_i32_0 : i32, i32
  }
  func.func @transform_4(%arg0: i32, %arg1: i32) -> (i32, i32, i32) {
    %c0_i32 = arith.constant 0 : i32
    %c0_i32_0 = arith.constant 0 : i32
    return %arg0, %arg1, %c0_i32 : i32, i32, i32
  }
}

module attributes {stable_mosaic.version = 11 : i64} {
  func.func @_conv5_globalmax_kernel(%arg0: i32, %arg1: i32, %arg2: memref<1x16x128xbf16, #tpu.memory_space<vmem>>, %arg3: memref<128x1024xbf16, #tpu.memory_space<vmem>>, %arg4: memref<1x1024xf32, #tpu.memory_space<vmem>>, %arg5: memref<1x1024xf32, #tpu.memory_space<vmem>>, %arg6: memref<1024x512xbf16, #tpu.memory_space<vmem>>, %arg7: memref<1x1x512xf32, #tpu.memory_space<vmem>>, %arg8: memref<1x1024xf32, #tpu.memory_space<vmem>>) attributes {dimension_semantics = [#tpu.dimension_semantics<parallel>, #tpu.dimension_semantics<arbitrary>], iteration_bounds = array<i64: 2, 1>, scalar_prefetch = 0 : i64, scratch_operands = 1 : i64, tpu.core_type = #tpu.core_type<tc>, window_params = [{transform_indices = @transform_0, window_bounds = array<i64: 1, 16, 128>}, {pipeline_mode = #tpu.pipeline_mode<synchronous>, transform_indices = @transform_1, window_bounds = array<i64: 128, 1024>}, {pipeline_mode = #tpu.pipeline_mode<synchronous>, transform_indices = @transform_2, window_bounds = array<i64: 1, 1024>}, {pipeline_mode = #tpu.pipeline_mode<synchronous>, transform_indices = @transform_3, window_bounds = array<i64: 1, 1024>}, {pipeline_mode = #tpu.pipeline_mode<synchronous>, transform_indices = @transform_4, window_bounds = array<i64: 1024, 512>}, {transform_indices = @transform_5, window_bounds = array<i64: 1, 1, 512>}]} {
    %c0_i32 = arith.constant 0 : i32
    %0 = arith.cmpi eq, %arg1, %c0_i32 : i32
    %1 = arith.extui %0 : i1 to i32
    %c0_i32_0 = arith.constant 0 : i32
    %2 = arith.cmpi ne, %1, %c0_i32_0 : i32
    scf.if %2 {
      %cst_17 = arith.constant 0xFF800000 : f32
      %23 = vector.broadcast %cst_17 : f32 to vector<1x1024xf32>
      %c0_18 = arith.constant 0 : index
      %c0_19 = arith.constant 0 : index
      %24 = vector.load %arg8[%c0_18, %c0_19] : memref<1x1024xf32, #tpu.memory_space<vmem>>, vector<1x1024xf32>
      tpu.vector_store %arg8[%c0_18, %c0_19], %23 {strides = array<i32>} : memref<1x1024xf32, #tpu.memory_space<vmem>>, vector<1x1024xf32>,
    } else {
    }
    %c0 = arith.constant 0 : index
    %c0_1 = arith.constant 0 : index
    %c0_2 = arith.constant 0 : index
    %3 = vector.load %arg2[%c0, %c0_1, %c0_2] : memref<1x16x128xbf16, #tpu.memory_space<vmem>>, vector<1x16x128xbf16>
    %4 = vector.shape_cast %3 : vector<1x16x128xbf16> to vector<16x128xbf16>
    %c0_3 = arith.constant 0 : index
    %c0_4 = arith.constant 0 : index
    %5 = vector.load %arg3[%c0_3, %c0_4] : memref<128x1024xbf16, #tpu.memory_space<vmem>>, vector<128x1024xbf16>
    %cst = arith.constant dense<0.000000e+00> : vector<16x1024xf32>
    %6 = tpu.matmul %4, %5, %cst {dimension_numbers = #tpu.dot_dimension_numbers<[1], [0], [0], [1], [0, 0, 1, 1], [], []>} : vector<16x128xbf16>, vector<128x1024xbf16>, vector<16x1024xf32> -> vector<16x1024xf32>
    %c0_5 = arith.constant 0 : index
    %c0_6 = arith.constant 0 : index
    %7 = vector.load %arg4[%c0_5, %c0_6] : memref<1x1024xf32, #tpu.memory_space<vmem>>, vector<1x1024xf32>
    %8 = vector.broadcast %7 : vector<1x1024xf32> to vector<16x1024xf32>
    %9 = arith.mulf %6, %8 : vector<16x1024xf32>
    %c0_7 = arith.constant 0 : index
    %c0_8 = arith.constant 0 : index
    %10 = vector.load %arg5[%c0_7, %c0_8] : memref<1x1024xf32, #tpu.memory_space<vmem>>, vector<1x1024xf32>
    %11 = vector.broadcast %10 : vector<1x1024xf32> to vector<16x1024xf32>
    %12 = arith.addf %9, %11 : vector<16x1024xf32>
    %cst_9 = arith.constant 0.000000e+00 : f32
    %13 = vector.broadcast %cst_9 : f32 to vector<16x1024xf32>
    %14 = arith.maximumf %12, %13 : vector<16x1024xf32>
    %c0_10 = arith.constant 0 : index
    %c0_11 = arith.constant 0 : index
    %15 = vector.load %arg8[%c0_10, %c0_11] : memref<1x1024xf32, #tpu.memory_space<vmem>>, vector<1x1024xf32>
    %cst_12 = arith.constant dense<0xFF800000> : vector<1024xf32>
    %16 = vector.multi_reduction <maximumf>, %14, %cst_12 [0] : vector<16x1024xf32> to vector<1024xf32>
    %17 = vector.shape_cast %16 : vector<1024xf32> to vector<1x1024xf32>
    %18 = arith.maximumf %15, %17 : vector<1x1024xf32>
    %c0_13 = arith.constant 0 : index
    %c0_14 = arith.constant 0 : index
    %19 = vector.load %arg8[%c0_13, %c0_14] : memref<1x1024xf32, #tpu.memory_space<vmem>>, vector<1x1024xf32>
    tpu.vector_store %arg8[%c0_13, %c0_14], %18 {strides = array<i32>} : memref<1x1024xf32, #tpu.memory_space<vmem>>, vector<1x1024xf32>,
    %c0_i32_15 = arith.constant 0 : i32
    %20 = arith.cmpi eq, %arg1, %c0_i32_15 : i32
    %21 = arith.extui %20 : i1 to i32
    %c0_i32_16 = arith.constant 0 : i32
    %22 = arith.cmpi ne, %21, %c0_i32_16 : i32
    scf.if %22 {
      %c0_17 = arith.constant 0 : index
      %c0_18 = arith.constant 0 : index
      %23 = vector.load %arg8[%c0_17, %c0_18] : memref<1x1024xf32, #tpu.memory_space<vmem>>, vector<1x1024xf32>
      %24 = arith.truncf %23 : vector<1x1024xf32> to vector<1x1024xbf16>
      %c0_19 = arith.constant 0 : index
      %c0_20 = arith.constant 0 : index
      %25 = vector.load %arg6[%c0_19, %c0_20] : memref<1024x512xbf16, #tpu.memory_space<vmem>>, vector<1024x512xbf16>
      %cst_21 = arith.constant dense<0.000000e+00> : vector<1x512xf32>
      %26 = tpu.matmul %24, %25, %cst_21 {dimension_numbers = #tpu.dot_dimension_numbers<[1], [0], [0], [1], [0, 0, 1, 1], [], []>} : vector<1x1024xbf16>, vector<1024x512xbf16>, vector<1x512xf32> -> vector<1x512xf32>
      %c0_22 = arith.constant 0 : index
      %c0_23 = arith.constant 0 : index
      %c0_24 = arith.constant 0 : index
      %27 = vector.load %arg7[%c0_22, %c0_23, %c0_24] : memref<1x1x512xf32, #tpu.memory_space<vmem>>, vector<1x1x512xf32>
      %28 = vector.shape_cast %27 : vector<1x1x512xf32> to vector<1x512xf32>
      %29 = vector.shape_cast %26 : vector<1x512xf32> to vector<1x1x512xf32>
      tpu.vector_store %arg7[%c0_22, %c0_23, %c0_24], %29 {strides = array<i32>} : memref<1x1x512xf32, #tpu.memory_space<vmem>>, vector<1x1x512xf32>,
    } else {
    }
    return
  }
  func.func @transform_0(%arg0: i32, %arg1: i32) -> (i32, i32, i32) {
    %c0_i32 = arith.constant 0 : i32
    %c0_i32_0 = arith.constant 0 : i32
    return %arg0, %arg1, %c0_i32 : i32, i32, i32
  }
  func.func @transform_1(%arg0: i32, %arg1: i32) -> (i32, i32) {
    %c0_i32 = arith.constant 0 : i32
    %c0_i32_0 = arith.constant 0 : i32
    %c0_i32_1 = arith.constant 0 : i32
    return %c0_i32, %c0_i32_0 : i32, i32
  }
  func.func @transform_2(%arg0: i32, %arg1: i32) -> (i32, i32) {
    %c0_i32 = arith.constant 0 : i32
    %c0_i32_0 = arith.constant 0 : i32
    %c0_i32_1 = arith.constant 0 : i32
    return %c0_i32, %c0_i32_0 : i32, i32
  }
  func.func @transform_3(%arg0: i32, %arg1: i32) -> (i32, i32) {
    %c0_i32 = arith.constant 0 : i32
    %c0_i32_0 = arith.constant 0 : i32
    %c0_i32_1 = arith.constant 0 : i32
    return %c0_i32, %c0_i32_0 : i32, i32
  }
  func.func @transform_4(%arg0: i32, %arg1: i32) -> (i32, i32) {
    %c0_i32 = arith.constant 0 : i32
    %c0_i32_0 = arith.constant 0 : i32
    %c0_i32_1 = arith.constant 0 : i32
    return %c0_i32, %c0_i32_0 : i32, i32
  }
  func.func @transform_5(%arg0: i32, %arg1: i32) -> (i32, i32, i32) {
    %c0_i32 = arith.constant 0 : i32
    %c0_i32_0 = arith.constant 0 : i32
    %c0_i32_1 = arith.constant 0 : i32
    return %arg0, %c0_i32, %c0_i32_0 : i32, i32, i32
  }
}

module attributes {stable_mosaic.version = 11 : i64} {
  func.func @_tail_kernel(%arg0: i32, %arg1: i32, %arg2: memref<1x16x128xbf16, #tpu.memory_space<vmem>>, %arg3: memref<1x1x512xf32, #tpu.memory_space<vmem>>, %arg4: memref<128x512xbf16, #tpu.memory_space<vmem>>, %arg5: memref<1x512xf32, #tpu.memory_space<vmem>>, %arg6: memref<1x512xf32, #tpu.memory_space<vmem>>, %arg7: memref<512x128xbf16, #tpu.memory_space<vmem>>, %arg8: memref<1x128xf32, #tpu.memory_space<vmem>>, %arg9: memref<1x128xf32, #tpu.memory_space<vmem>>, %arg10: memref<128x8xbf16, #tpu.memory_space<vmem>>, %arg11: memref<1x16x8xf32, #tpu.memory_space<vmem>>) attributes {dimension_semantics = [#tpu.dimension_semantics<parallel>, #tpu.dimension_semantics<parallel>], iteration_bounds = array<i64: 2, 1>, scalar_prefetch = 0 : i64, scratch_operands = 0 : i64, tpu.core_type = #tpu.core_type<tc>, window_params = [{transform_indices = @transform_0, window_bounds = array<i64: 1, 16, 128>}, {transform_indices = @transform_1, window_bounds = array<i64: 1, 1, 512>}, {pipeline_mode = #tpu.pipeline_mode<synchronous>, transform_indices = @transform_2, window_bounds = array<i64: 128, 512>}, {pipeline_mode = #tpu.pipeline_mode<synchronous>, transform_indices = @transform_3, window_bounds = array<i64: 1, 512>}, {pipeline_mode = #tpu.pipeline_mode<synchronous>, transform_indices = @transform_4, window_bounds = array<i64: 1, 512>}, {pipeline_mode = #tpu.pipeline_mode<synchronous>, transform_indices = @transform_5, window_bounds = array<i64: 512, 128>}, {pipeline_mode = #tpu.pipeline_mode<synchronous>, transform_indices = @transform_6, window_bounds = array<i64: 1, 128>}, {pipeline_mode = #tpu.pipeline_mode<synchronous>, transform_indices = @transform_7, window_bounds = array<i64: 1, 128>}, {pipeline_mode = #tpu.pipeline_mode<synchronous>, transform_indices = @transform_8, window_bounds = array<i64: 128, 8>}, {transform_indices = @transform_9, window_bounds = array<i64: 1, 16, 8>}]} {
    %c0 = arith.constant 0 : index
    %c0_0 = arith.constant 0 : index
    %c0_1 = arith.constant 0 : index
    %0 = vector.load %arg2[%c0, %c0_0, %c0_1] : memref<1x16x128xbf16, #tpu.memory_space<vmem>>, vector<1x16x128xbf16>
    %1 = vector.shape_cast %0 : vector<1x16x128xbf16> to vector<16x128xbf16>
    %c0_2 = arith.constant 0 : index
    %c0_3 = arith.constant 0 : index
    %2 = vector.load %arg4[%c0_2, %c0_3] : memref<128x512xbf16, #tpu.memory_space<vmem>>, vector<128x512xbf16>
    %cst = arith.constant dense<0.000000e+00> : vector<16x512xf32>
    %3 = tpu.matmul %1, %2, %cst {dimension_numbers = #tpu.dot_dimension_numbers<[1], [0], [0], [1], [0, 0, 1, 1], [], []>} : vector<16x128xbf16>, vector<128x512xbf16>, vector<16x512xf32> -> vector<16x512xf32>
    %c0_4 = arith.constant 0 : index
    %c0_5 = arith.constant 0 : index
    %c0_6 = arith.constant 0 : index
    %4 = vector.load %arg3[%c0_4, %c0_5, %c0_6] : memref<1x1x512xf32, #tpu.memory_space<vmem>>, vector<1x1x512xf32>
    %5 = vector.shape_cast %4 : vector<1x1x512xf32> to vector<1x512xf32>
    %6 = vector.broadcast %5 : vector<1x512xf32> to vector<16x512xf32>
    %7 = arith.addf %3, %6 : vector<16x512xf32>
    %c0_7 = arith.constant 0 : index
    %c0_8 = arith.constant 0 : index
    %8 = vector.load %arg5[%c0_7, %c0_8] : memref<1x512xf32, #tpu.memory_space<vmem>>, vector<1x512xf32>
    %9 = vector.broadcast %8 : vector<1x512xf32> to vector<16x512xf32>
    %10 = arith.mulf %7, %9 : vector<16x512xf32>
    %c0_9 = arith.constant 0 : index
    %c0_10 = arith.constant 0 : index
    %11 = vector.load %arg6[%c0_9, %c0_10] : memref<1x512xf32, #tpu.memory_space<vmem>>, vector<1x512xf32>
    %12 = vector.broadcast %11 : vector<1x512xf32> to vector<16x512xf32>
    %13 = arith.addf %10, %12 : vector<16x512xf32>
    %cst_11 = arith.constant 0.000000e+00 : f32
    %14 = vector.broadcast %cst_11 : f32 to vector<16x512xf32>
    %15 = arith.maximumf %13, %14 : vector<16x512xf32>
    %16 = arith.truncf %15 : vector<16x512xf32> to vector<16x512xbf16>
    %c0_12 = arith.constant 0 : index
    %c0_13 = arith.constant 0 : index
    %17 = vector.load %arg7[%c0_12, %c0_13] : memref<512x128xbf16, #tpu.memory_space<vmem>>, vector<512x128xbf16>
    %cst_14 = arith.constant dense<0.000000e+00> : vector<16x128xf32>
    %18 = tpu.matmul %16, %17, %cst_14 {dimension_numbers = #tpu.dot_dimension_numbers<[1], [0], [0], [1], [0, 0, 1, 1], [], []>} : vector<16x512xbf16>, vector<512x128xbf16>, vector<16x128xf32> -> vector<16x128xf32>
    %c0_15 = arith.constant 0 : index
    %c0_16 = arith.constant 0 : index
    %19 = vector.load %arg8[%c0_15, %c0_16] : memref<1x128xf32, #tpu.memory_space<vmem>>, vector<1x128xf32>
    %20 = vector.broadcast %19 : vector<1x128xf32> to vector<16x128xf32>
    %21 = arith.mulf %18, %20 : vector<16x128xf32>
    %c0_17 = arith.constant 0 : index
    %c0_18 = arith.constant 0 : index
    %22 = vector.load %arg9[%c0_17, %c0_18] : memref<1x128xf32, #tpu.memory_space<vmem>>, vector<1x128xf32>
    %23 = vector.broadcast %22 : vector<1x128xf32> to vector<16x128xf32>
    %24 = arith.addf %21, %23 : vector<16x128xf32>
    %cst_19 = arith.constant 0.000000e+00 : f32
    %25 = vector.broadcast %cst_19 : f32 to vector<16x128xf32>
    %26 = arith.maximumf %24, %25 : vector<16x128xf32>
    %27 = arith.truncf %26 : vector<16x128xf32> to vector<16x128xbf16>
    %c0_20 = arith.constant 0 : index
    %c0_21 = arith.constant 0 : index
    %28 = vector.load %arg10[%c0_20, %c0_21] : memref<128x8xbf16, #tpu.memory_space<vmem>>, vector<128x8xbf16>
    %cst_22 = arith.constant dense<0.000000e+00> : vector<16x8xf32>
    %29 = tpu.matmul %27, %28, %cst_22 {dimension_numbers = #tpu.dot_dimension_numbers<[1], [0], [0], [1], [0, 0, 1, 1], [], []>} : vector<16x128xbf16>, vector<128x8xbf16>, vector<16x8xf32> -> vector<16x8xf32>
    %cst_23 = arith.constant 0.000000e+00 : f32
    %30 = vector.broadcast %cst_23 : f32 to vector<16x8xf32>
    %31 = arith.maximumf %29, %30 : vector<16x8xf32>
    %c0_24 = arith.constant 0 : index
    %c0_25 = arith.constant 0 : index
    %c0_26 = arith.constant 0 : index
    %32 = vector.load %arg11[%c0_24, %c0_25, %c0_26] : memref<1x16x8xf32, #tpu.memory_space<vmem>>, vector<1x16x8xf32>
    %33 = vector.shape_cast %32 : vector<1x16x8xf32> to vector<16x8xf32>
    %34 = vector.shape_cast %31 : vector<16x8xf32> to vector<1x16x8xf32>
    tpu.vector_store %arg11[%c0_24, %c0_25, %c0_26], %34 {strides = array<i32>} : memref<1x16x8xf32, #tpu.memory_space<vmem>>, vector<1x16x8xf32>,
    return
  }
  func.func @transform_0(%arg0: i32, %arg1: i32) -> (i32, i32, i32) {
    %c0_i32 = arith.constant 0 : i32
    %c0_i32_0 = arith.constant 0 : i32
    return %arg0, %arg1, %c0_i32 : i32, i32, i32
  }
  func.func @transform_1(%arg0: i32, %arg1: i32) -> (i32, i32, i32) {
    %c0_i32 = arith.constant 0 : i32
    %c0_i32_0 = arith.constant 0 : i32
    %c0_i32_1 = arith.constant 0 : i32
    return %arg0, %c0_i32, %c0_i32_0 : i32, i32, i32
  }
  func.func @transform_2(%arg0: i32, %arg1: i32) -> (i32, i32) {
    %c0_i32 = arith.constant 0 : i32
    %c0_i32_0 = arith.constant 0 : i32
    %c0_i32_1 = arith.constant 0 : i32
    return %c0_i32, %c0_i32_0 : i32, i32
  }
  func.func @transform_3(%arg0: i32, %arg1: i32) -> (i32, i32) {
    %c0_i32 = arith.constant 0 : i32
    %c0_i32_0 = arith.constant 0 : i32
    %c0_i32_1 = arith.constant 0 : i32
    return %c0_i32, %c0_i32_0 : i32, i32
  }
  func.func @transform_4(%arg0: i32, %arg1: i32) -> (i32, i32) {
    %c0_i32 = arith.constant 0 : i32
    %c0_i32_0 = arith.constant 0 : i32
    %c0_i32_1 = arith.constant 0 : i32
    return %c0_i32, %c0_i32_0 : i32, i32
  }
  func.func @transform_5(%arg0: i32, %arg1: i32) -> (i32, i32) {
    %c0_i32 = arith.constant 0 : i32
    %c0_i32_0 = arith.constant 0 : i32
    %c0_i32_1 = arith.constant 0 : i32
    return %c0_i32, %c0_i32_0 : i32, i32
  }
  func.func @transform_6(%arg0: i32, %arg1: i32) -> (i32, i32) {
    %c0_i32 = arith.constant 0 : i32
    %c0_i32_0 = arith.constant 0 : i32
    %c0_i32_1 = arith.constant 0 : i32
    return %c0_i32, %c0_i32_0 : i32, i32
  }
  func.func @transform_7(%arg0: i32, %arg1: i32) -> (i32, i32) {
    %c0_i32 = arith.constant 0 : i32
    %c0_i32_0 = arith.constant 0 : i32
    %c0_i32_1 = arith.constant 0 : i32
    return %c0_i32, %c0_i32_0 : i32, i32
  }
  func.func @transform_8(%arg0: i32, %arg1: i32) -> (i32, i32) {
    %c0_i32 = arith.constant 0 : i32
    %c0_i32_0 = arith.constant 0 : i32
    %c0_i32_1 = arith.constant 0 : i32
    return %c0_i32, %c0_i32_0 : i32, i32
  }
  func.func @transform_9(%arg0: i32, %arg1: i32) -> (i32, i32, i32) {
    %c0_i32 = arith.constant 0 : i32
    %c0_i32_0 = arith.constant 0 : i32
    return %arg0, %arg1, %c0_i32 : i32, i32, i32
  }
}

</mosaic_0001>

<bundles_post_ra>
// kernel: dgcnn_seg_forward.6
= control target key start
LH: loop header
LB: loop body
LE: loop exit
PB: predicated region body
PF: predicated region fallthrough
CT: control target
= control target key end

     0   :  { %s524_s15 = smov 0   ;;  %s526_s16 = smov 0   ;;  %s566_s0 = inlined_call_operand.vmem [shape: bf16[2,16,4], index: 0, kind: input, shape index: {}]   ;;  %s567_s1 = inlined_call_operand.vmem [shape: bf16[4,128], index: 1, kind: input, shape index: {}]   ;;  %s568_s2 = inlined_call_operand.vmem [shape: f32[1,128], index: 2, kind: input, shape index: {}]   ;;  %s569_s3 = inlined_call_operand.vmem [shape: f32[1,128], index: 3, kind: input, shape index: {}]   ;;  %s570_s4 = inlined_call_operand.vmem [shape: bf16[2,16,128], index: 4, kind: output, shape index: {}]  }
   0x1   :  { %s528_s17 = smov 0  }
   0x2 LB: > { %s26_s18 = sadd.s32 1, %s491_s16  ;;  %p416_p0 = scmp.ge.s32.totalorder %s495_s17, 1  ;;  %s495_s17 = sphi %s528_s17, %s14_s17   ;;  %s491_s16 = sphi %s526_s16, %s572_s16   ;;  %s487_s15 = sphi %s524_s15, %s571_s15  }
   0x3   : > { %p28_p1 = scmp.ge.s32.totalorder %s26_s18, 2  ;;  %p183_p2 = scmp.lt.s32.totalorder %s495_s17, 3 }
   0x5   : > { %s574_s18 = smov (%p28_p1, %s26_s18), 0  ;;  %p184_p3 = pnand %p416_p0, %p183_p2 }
   0x6   : > { %v240_v0 = vld [vmem:[%s567_s1] sm:$0x3] (!%p184_p3)  ;;  %vm250_vm0 = vcmask (!%p184_p3), 1041408   ;;  %p218_p4 = scmp.lt.s32.totalorder (!%p184_p3), %s487_s15, 1  ;;  %v497_v1 = vmov (!%p184_p3), 0.0   ;;  %vm498_vm1 = vmmov (!%p184_p3), 0  }
   0x7   : > { %187 = sbr.rel (%p184_p3) target bundleno = 241 (0xf1), region = 36  ;;  %440 = vmatprep.subr.bf16.mxu0 (!%p184_p3), %v497_v1  ;;  %v252_v2 = vsel (!%p184_p3), %vm250_vm0, %v240_v0, 0  ;;  %442 = vmatprep.mubr.msk.bf16.mxu0 (!%p184_p3), %vm498_vm1, %v497_v1  ;;  %vm246_vm2 = vcmask (!%p184_p3), 31744   ;;  %v423_v4 = vld [vmem:[%s568_s2] ss:$0 sm:$0xff] (!%p184_p3) }
   0x8   : > { %441 = vmatpush3.bf16.msra.mxu0 (!%p184_p3), %v252_v2  ;;  %v424_v6 = vld [vmem:[%s569_s3] ss:$0 sm:$0xff] (!%p184_p3) }
   0xe   : > { %s576_s15 = smov (!%p218_p4, %s487_s15), 1 }
   0xf   : > { %s429_s21 = sshll.u32 %s576_s15, 3 }
  0x10   : > { %s225_s24 = scalar_lea.vmem %s566_s0, %s429_s21  ;;  %s235_s5 = scalar_lea.vmem %s570_s4, %s429_s21 }
  0x11   : > { %v472_v3 = vld [vmem:[%s225_s24] sm:$0xff]  }
  0x12   : > { %443 = vmatmul.mubr.msk.bf16.vlgmr.msra.gmra.mrb[0].mxu0 %vm246_vm2, %v472_v3 }
  0xe5   : > { %v288_v5 = vpop.f32.mrb[0].mxu0 }
  0xe6   : > { %v302_v7 = vmul.f32 %v423_v4, %v288_v5  ;;  %v444_v8 = vpop.f32.mrb[1].mxu0 }
  0xe7   : > { %v291_v9 = vpop.f32.mrb[2].mxu0 }
  0xe8   : > { %v311_v10 = vadd.f32 %v424_v6, %v302_v7  ;;  %v303_v11 = vmul.f32 %v423_v4, %v291_v9  ;;  %v445_v12 = vpop.f32.mrb[3].mxu0 }
  0xea   : > { %v312_v13 = vadd.f32 %v424_v6, %v303_v11  ;;  %v313_v14 = vmax.f32 %v311_v10, 0.0 }
  0xec   : > { %v314_v15 = vmax.f32 %v312_v13, 0.0 }
  0xee   : > { %v436_v16 = vpack.c.bf16 %v314_v15, %v313_v14 }
  0xf0   : > { %437 = vst [vmem:[%s235_s5] sm:$0xff] %v436_v16  }
  0xf1 PF: > { %s14_s17 = sadd.s32 1, %s495_s17   ;;  %s571_s15 = smov %s491_s16 }
  0xf2   : > { %p11_p5 = scmp.ge.s32.totalorder %s14_s17, 4   ;;  %s572_s16 = smov %s574_s18 }
  0xf4   :  { %13 = sbr.rel (!%p11_p5) target bundleno = 2 (0x2), region = 66 }

// kernel: dgcnn_seg_forward.7
= control target key start
LH: loop header
LB: loop body
LE: loop exit
PB: predicated region body
PF: predicated region fallthrough
CT: control target
= control target key end

     0   :  { %s616_s15 = smov 0   ;;  %s618_s16 = smov 0   ;;  %s686_s0 = inlined_call_operand.vmem [shape: bf16[2,16,128], index: 0, kind: input, shape index: {}]   ;;  %s687_s1 = inlined_call_operand.vmem [shape: bf16[128,128], index: 1, kind: input, shape index: {}]   ;;  %s688_s2 = inlined_call_operand.vmem [shape: f32[1,128], index: 2, kind: input, shape index: {}]   ;;  %s689_s3 = inlined_call_operand.vmem [shape: f32[1,128], index: 3, kind: input, shape index: {}]   ;;  %s690_s4 = inlined_call_operand.vmem [shape: bf16[2,16,128], index: 4, kind: output, shape index: {}]  }
   0x1   :  { %s620_s17 = smov 0  }
   0x2 LB: > { %s26_s18 = sadd.s32 1, %s583_s16  ;;  %p472_p0 = scmp.ge.s32.totalorder %s587_s17, 1  ;;  %s587_s17 = sphi %s620_s17, %s14_s17   ;;  %s583_s16 = sphi %s618_s16, %s692_s16   ;;  %s579_s15 = sphi %s616_s15, %s691_s15  }
   0x3   : > { %p28_p1 = scmp.ge.s32.totalorder %s26_s18, 2  ;;  %p183_p2 = scmp.lt.s32.totalorder %s587_s17, 3 }
   0x5   : > { %s694_s18 = smov (%p28_p1, %s26_s18), 0  ;;  %p184_p3 = pnand %p472_p0, %p183_p2 }
   0x6   : > { %v556_v0 = vld [vmem:[%s687_s1] sm:$0xff] (!%p184_p3)   ;;  %v589_v1 = vmov (!%p184_p3), 0.0   ;;  %v557_v2 = vld [vmem:[%s687_s1 + $0x8] sm:$0xff] (!%p184_p3)   ;;  %vm590_vm0 = vmmov (!%p184_p3), 0   ;;  %p218_p4 = scmp.lt.s32.totalorder (!%p184_p3), %s579_s15, 1  ;;  %v558_v3 = vld [vmem:[%s687_s1 + $0x10] sm:$0xff] (!%p184_p3)  }
   0x7   : > { %187 = sbr.rel (%p184_p3) target bundleno = 262 (0x106), region = 36  ;;  %510 = vmatprep.subr.bf16.mxu0 (!%p184_p3), %v589_v1  ;;  %526 = vmatprep.mubr.msk.bf16.mxu0 (!%p184_p3), %vm590_vm0, %v589_v1  ;;  %v559_v4 = vld [vmem:[%s687_s1 + $0x18] sm:$0xff] (!%p184_p3)   ;;  %v560_v5 = vld [vmem:[%s687_s1 + $0x20] sm:$0xff] (!%p184_p3)   ;;  %v561_v6 = vld [vmem:[%s687_s1 + $0x28] sm:$0xff] (!%p184_p3)  }
   0x8   : > { %511 = vmatpush3.bf16.msra.mxu0 (!%p184_p3), %v556_v0  ;;  %v562_v7 = vld [vmem:[%s687_s1 + $0x30] sm:$0xff] (!%p184_p3)   ;;  %v563_v8 = vld [vmem:[%s687_s1 + $0x38] sm:$0xff] (!%p184_p3)   ;;  %v486_v10 = vld [vmem:[%s688_s2] ss:$0 sm:$0xff] (!%p184_p3) }
   0x9   : > { %512 = vmatprep.subr.bf16.mxu0 (!%p184_p3), %v589_v1  ;;  %v487_v12 = vld [vmem:[%s689_s3] ss:$0 sm:$0xff] (!%p184_p3) }
   0xc   : > { %513 = vmatpush3.bf16.msra.mxu0 (!%p184_p3), %v557_v2 }
   0xd   : > { %514 = vmatprep.subr.bf16.mxu0 (!%p184_p3), %v589_v1 }
   0xe   : > { %s696_s15 = smov (!%p218_p4, %s579_s15), 1 }
   0xf   : > { %s492_s25 = sshll.u32 %s696_s15, 3 }
  0x10   : > { %s225_s28 = scalar_lea.vmem %s686_s0, %s492_s25  ;;  %515 = vmatpush3.bf16.msra.mxu0 %v558_v3  ;;  %s235_s23 = scalar_lea.vmem %s690_s4, %s492_s25 }
  0x11   : > { %516 = vmatprep.subr.bf16.mxu0 %v589_v1  ;;  %v564_v9 = vld [vmem:[%s225_s28] sm:$0xff]  }
  0x14   : > { %517 = vmatpush3.bf16.msra.mxu0 %v559_v4 }
  0x15   : > { %518 = vmatprep.subr.bf16.mxu0 %v589_v1 }
  0x18   : > { %519 = vmatpush3.bf16.msra.mxu0 %v560_v5 }
  0x19   : > { %520 = vmatprep.subr.bf16.mxu0 %v589_v1 }
  0x1c   : > { %521 = vmatpush3.bf16.msra.mxu0 %v561_v6 }
  0x1d   : > { %522 = vmatprep.subr.bf16.mxu0 %v589_v1 }
  0x20   : > { %523 = vmatpush3.bf16.msra.mxu0 %v562_v7 }
  0x21   : > { %524 = vmatprep.subr.bf16.mxu0 %v589_v1 }
  0x24   : > { %525 = vmatpush3.bf16.msra.mxu0 %v563_v8 }
  0x27   : > { %527 = vmatmul.mubr.bf16.vlgmr.msra.gmra.mrb[0].mxu0 %v564_v9 }
  0xfa   : > { %v344_v11 = vpop.f32.mrb[0].mxu0 }
  0xfb   : > { %v358_v13 = vmul.f32 %v486_v10, %v344_v11  ;;  %v528_v14 = vpop.f32.mrb[1].mxu0 }
  0xfc   : > { %v347_v15 = vpop.f32.mrb[2].mxu0 }
  0xfd   : > { %v367_v16 = vadd.f32 %v487_v12, %v358_v13  ;;  %v359_v17 = vmul.f32 %v486_v10, %v347_v15  ;;  %v529_v18 = vpop.f32.mrb[3].mxu0 }
  0xff   : > { %v368_v19 = vadd.f32 %v487_v12, %v359_v17  ;;  %v369_v20 = vmax.f32 %v367_v16, 0.0 }
 0x101   : > { %v370_v21 = vmax.f32 %v368_v19, 0.0 }
 0x103   : > { %v499_v22 = vpack.c.bf16 %v370_v21, %v369_v20 }
 0x105   : > { %500 = vst [vmem:[%s235_s23] sm:$0xff] %v499_v22  }
 0x106 PF: > { %s14_s17 = sadd.s32 1, %s587_s17   ;;  %s691_s15 = smov %s583_s16 }
 0x107   : > { %p11_p5 = scmp.ge.s32.totalorder %s14_s17, 4   ;;  %s692_s16 = smov %s694_s18 }
 0x109   :  { %13 = sbr.rel (!%p11_p5) target bundleno = 2 (0x2), region = 66 }

// kernel: dgcnn_seg_forward.11
= control target key start
LH: loop header
LB: loop body
LE: loop exit
PB: predicated region body
PF: predicated region fallthrough
CT: control target
= control target key end

     0   :  { %s1693_s30 = smov 0   ;;  %s1695_s10 = smov 0   ;;  %s1975_s0 = inlined_call_operand.vmem [shape: bf16[2,16,128], index: 0, kind: input, shape index: {}]   ;;  %s1976_s1 = inlined_call_operand.vmem [shape: f32[2,1,512], index: 1, kind: input, shape index: {}]   ;;  %s1977_s2 = inlined_call_operand.vmem [shape: bf16[128,512], index: 2, kind: input, shape index: {}]   ;;  %s1978_s3 = inlined_call_operand.vmem [shape: f32[1,512], index: 3, kind: input, shape index: {}]   ;;  %s1979_s4 = inlined_call_operand.vmem [shape: f32[1,512], index: 4, kind: input, shape index: {}]   ;;  %s1980_s5 = inlined_call_operand.vmem [shape: bf16[512,128], index: 5, kind: input, shape index: {}]   ;;  %s1981_s6 = inlined_call_operand.vmem [shape: f32[1,128], index: 6, kind: input, shape index: {}]   ;;  %s1982_s7 = inlined_call_operand.vmem [shape: f32[1,128], index: 7, kind: input, shape index: {}]   ;;  %s1983_s8 = inlined_call_operand.vmem [shape: bf16[128,8], index: 8, kind: input, shape index: {}]   ;;  %s1984_s9 = inlined_call_operand.vmem [shape: f32[2,16,8], index: 9, kind: output, shape index: {}]  }
   0x1   :  { %s1697_s11 = smov 0  }
   0x2 LB: > { %s31_s12 = sadd.s32 1, %s1634_s10  ;;  %p1342_p0 = scmp.ge.s32.totalorder %s1638_s11, 1  ;;  %s1638_s11 = sphi %s1697_s11, %s19_s11   ;;  %s1634_s10 = sphi %s1695_s10, %s1986_s10   ;;  %s1630_s30 = sphi %s1693_s30, %s1985_s30  }
   0x3   : > { %p33_p1 = scmp.ge.s32.totalorder %s31_s12, 2  ;;  %p317_p2 = scmp.lt.s32.totalorder %s1638_s11, 3 }
   0x5   : > { %s1988_s12 = smov (%p33_p1, %s31_s12), 0  ;;  %p318_p3 = pnand %p1342_p0, %p317_p2 }
   0x6   : > { %v1527_v0 = vld [vmem:[%s1977_s2 + $0x4] ss:$16 sps:$4 sm:$0xff] (!%p318_p3)   ;;  %v1529_v1 = vld [vmem:[%s1977_s2 + $0xc] ss:$16 sps:$4 sm:$0xff] (!%p318_p3)   ;;  %v1640_v2 = vmov (!%p318_p3), 0   ;;  %p366_p4 = scmp.lt.s32.totalorder (!%p318_p3), %s1630_s30, 1 }
   0x7   : > { %321 = sbr.rel (%p318_p3) target bundleno = 710 (0x2c6), region = 56  ;;  %644 = vmatprep.mubr.bf16.mxu0 (!%p318_p3), %v1640_v2  ;;  %687 = vmatprep.mubr.bf16.mxu1 (!%p318_p3), %v1640_v2  ;;  %v1531_v3 = vld [vmem:[%s1977_s2] ss:$16 sps:$4 sm:$0xff] (!%p318_p3)   ;;  %v1532_v4 = vld [vmem:[%s1977_s2 + $0x8] ss:$16 sps:$4 sm:$0xff] (!%p318_p3)   ;;  %v1641_v2 = vmov (!%p318_p3), 0.0  }
   0x8   : > { %612 = vmatprep.subr.bf16.mxu0 (!%p318_p3), %v1527_v0  ;;  %655 = vmatprep.subr.bf16.mxu1 (!%p318_p3), %v1529_v1  ;;  %v1533_v5 = vld [vmem:[%s1977_s2 + $0x24] ss:$16 sps:$4 sm:$0xff] (!%p318_p3)   ;;  %v1535_v6 = vld [vmem:[%s1977_s2 + $0x2c] ss:$16 sps:$4 sm:$0xff] (!%p318_p3)   ;;  %v1537_v7 = vld [vmem:[%s1977_s2 + $0x20] ss:$16 sps:$4 sm:$0xff] (!%p318_p3)  }
   0x9   : > { %613 = vmatpush1.bf16.msra.mxu0 (!%p318_p3), %v1531_v3  ;;  %656 = vmatpush1.bf16.msra.mxu1 (!%p318_p3), %v1532_v4  ;;  %v1538_v8 = vld [vmem:[%s1977_s2 + $0x28] ss:$16 sps:$4 sm:$0xff] (!%p318_p3)   ;;  %v1539_v9 = vld [vmem:[%s1977_s2 + $0x44] ss:$16 sps:$4 sm:$0xff] (!%p318_p3)   ;;  %v1541_v10 = vld [vmem:[%s1977_s2 + $0x4c] ss:$16 sps:$4 sm:$0xff] (!%p318_p3)   ;;  %v426_v3 = vlaneseq (!%p318_p3) }
   0xa   : > { %614 = vmatprep.subr.bf16.mxu0 (!%p318_p3), %v1533_v5  ;;  %657 = vmatprep.subr.bf16.mxu1 (!%p318_p3), %v1535_v6  ;;  %v1543_v11 = vld [vmem:[%s1977_s2 + $0x40] ss:$16 sps:$4 sm:$0xff] (!%p318_p3)   ;;  %v1544_v12 = vld [vmem:[%s1977_s2 + $0x48] ss:$16 sps:$4 sm:$0xff] (!%p318_p3)   ;;  %v1545_v13 = vld [vmem:[%s1977_s2 + $0x64] ss:$16 sps:$4 sm:$0xff] (!%p318_p3)  }
   0xb   : > { %v1547_v14 = vld [vmem:[%s1977_s2 + $0x6c] ss:$16 sps:$4 sm:$0xff] (!%p318_p3)   ;;  %v1549_v15 = vld [vmem:[%s1977_s2 + $0x60] ss:$16 sps:$4 sm:$0xff] (!%p318_p3)   ;;  %v1550_v16 = vld [vmem:[%s1977_s2 + $0x68] ss:$16 sps:$4 sm:$0xff] (!%p318_p3)  }
   0xc   : > { %v1551_v17 = vld [vmem:[%s1977_s2 + $0x84] ss:$16 sps:$4 sm:$0xff] (!%p318_p3)   ;;  %v1553_v18 = vld [vmem:[%s1977_s2 + $0x8c] ss:$16 sps:$4 sm:$0xff] (!%p318_p3)   ;;  %v1555_v19 = vld [vmem:[%s1977_s2 + $0x80] ss:$16 sps:$4 sm:$0xff] (!%p318_p3)  }
   0xd   : > { %615 = vmatpush1.bf16.msra.mxu0 (!%p318_p3), %v1537_v7  ;;  %658 = vmatpush1.bf16.msra.mxu1 (!%p318_p3), %v1538_v8  ;;  %v1556_v20 = vld [vmem:[%s1977_s2 + $0x88] ss:$16 sps:$4 sm:$0xff] (!%p318_p3)   ;;  %v1557_v21 = vld [vmem:[%s1977_s2 + $0xa4] ss:$16 sps:$4 sm:$0xff] (!%p318_p3)   ;;  %v1559_v22 = vld [vmem:[%s1977_s2 + $0xac] ss:$16 sps:$4 sm:$0xff] (!%p318_p3)  }
   0xe   : > { %616 = vmatprep.subr.bf16.mxu0 %v1539_v9  ;;  %659 = vmatprep.subr.bf16.mxu1 %v1541_v10  ;;  %s1990_s30 = smov (!%p366_p4, %s1630_s30), 1  ;;  %v1561_v23 = vld [vmem:[%s1977_s2 + $0xa0] ss:$16 sps:$4 sm:$0xff]   ;;  %v1562_v24 = vld [vmem:[%s1977_s2 + $0xa8] ss:$16 sps:$4 sm:$0xff]   ;;  %v427_v4 = vshrl.u32 %v426_v3, 7 }
   0xf   : > { %s1425_s23 = sshll.u32 %s1990_s30, 3  ;;  %v1563_v25 = vld [vmem:[%s1977_s2 + $0xc4] ss:$16 sps:$4 sm:$0xff]   ;;  %v1565_v26 = vld [vmem:[%s1977_s2 + $0xcc] ss:$16 sps:$4 sm:$0xff]   ;;  %s1345_s26 = sshll.u32 %s1990_s30, 2 }
  0x10   : > { %s373_s15 = scalar_lea.vmem %s1975_s0, %s1425_s23  ;;  %v1567_v27 = vld [vmem:[%s1977_s2 + $0xc0] ss:$16 sps:$4 sm:$0xff]   ;;  %v1568_v28 = vld [vmem:[%s1977_s2 + $0xc8] ss:$16 sps:$4 sm:$0xff]   ;;  %v1569_v29 = vld [vmem:[%s1977_s2 + $0xe4] ss:$16 sps:$4 sm:$0xff]   ;;  %s378_s29 = scalar_lea.vmem %s1976_s1, %s1345_s26 }
  0x11   : > { %617 = vmatpush1.bf16.msra.mxu0 %v1543_v11  ;;  %660 = vmatpush1.bf16.msra.mxu1 %v1544_v12  ;;  %v1571_v30 = vld [vmem:[%s1977_s2 + $0xec] ss:$16 sps:$4 sm:$0xff]   ;;  %v1573_v31 = vld [vmem:[%s1977_s2 + $0xe0] ss:$16 sps:$4 sm:$0xff]   ;;  %v1574_v32 = vld [vmem:[%s1977_s2 + $0xe8] ss:$16 sps:$4 sm:$0xff]  }
  0x12   : > { %618 = vmatprep.subr.bf16.mxu0 %v1545_v13  ;;  %661 = vmatprep.subr.bf16.mxu1 %v1547_v14  ;;  %v1576_v33 = vld [vmem:[%s1980_s5 + $0x40] sm:$0xff]   ;;  %v1580_v38 = vld [vmem:[%s1980_s5 + $0x48] sm:$0xff]   ;;  %v1584_v42 = vld [vmem:[%s1980_s5 + $0x50] sm:$0xff]   ;;  %v428_v5 = vsub.s32 0, %v427_v4  ;;  %v436_v6 = vsub.s32 2, %v427_v4  ;;  %v432_v8 = vsub.s32 1, %v427_v4 }
  0x13   : > { %v1575_v34 = vld [vmem:[%s373_s15] sm:$0xff]   ;;  %v1581_v39 = vld [vmem:[%s1980_s5 + $0xc8] sm:$0xff]   ;;  %v1585_v43 = vld [vmem:[%s1980_s5 + $0xd0] sm:$0xff]   ;;  %v440_v9 = vsub.s32 3, %v427_v4  ;;  %vm1642_vm0 = vmmov 0   ;;  %s1426_s21 = sshll.u32 %s1990_s30, 4 }
  0x14   : > { %v1577_v35 = vld [vmem:[%s1980_s5 + $0xc0] sm:$0xff]   ;;  %v1582_v40 = vld [vmem:[%s1980_s5 + $0x8] sm:$0xff]   ;;  %v1586_v44 = vld [vmem:[%s1980_s5 + $0x10] sm:$0xff]   ;;  %s387_s15 = scalar_lea.vmem %s1984_s9, %s1426_s21  ;;  %vm1236_vm1 = vcmask 64512  }
  0x15   : > { %619 = vmatpush1.bf16.msra.mxu0 %v1549_v15  ;;  %662 = vmatpush1.bf16.msra.mxu1 %v1550_v16  ;;  %v1578_v36 = vld [vmem:[%s1980_s5] sm:$0xff]   ;;  %v1583_v41 = vld [vmem:[%s1980_s5 + $0x88] sm:$0xff]   ;;  %v1587_v45 = vld [vmem:[%s1980_s5 + $0x90] sm:$0xff]  }
  0x16   : > { %620 = vmatprep.subr.bf16.mxu0 %v1551_v17  ;;  %663 = vmatprep.subr.bf16.mxu1 %v1553_v18  ;;  %v1579_v37 = vld [vmem:[%s1980_s5 + $0x80] sm:$0xff]   ;;  %v1588_v46 = vld [vmem:[%s1980_s5 + $0x58] sm:$0xff]   ;;  %v1596_v54 = vld [vmem:[%s1980_s5 + $0x68] sm:$0xff]  }
  0x17   : > { %v1589_v47 = vld [vmem:[%s1980_s5 + $0xd8] sm:$0xff]   ;;  %v1592_v50 = vld [vmem:[%s1980_s5 + $0x60] sm:$0xff]   ;;  %v1597_v55 = vld [vmem:[%s1980_s5 + $0xe8] sm:$0xff]  }
  0x18   : > { %v1590_v48 = vld [vmem:[%s1980_s5 + $0x18] sm:$0xff]   ;;  %v1593_v51 = vld [vmem:[%s1980_s5 + $0xe0] sm:$0xff]   ;;  %v1598_v56 = vld [vmem:[%s1980_s5 + $0x28] sm:$0xff]  }
  0x19   : > { %621 = vmatpush1.bf16.msra.mxu0 %v1555_v19  ;;  %664 = vmatpush1.bf16.msra.mxu1 %v1556_v20  ;;  %v1591_v49 = vld [vmem:[%s1980_s5 + $0x98] sm:$0xff]   ;;  %v1594_v52 = vld [vmem:[%s1980_s5 + $0x20] sm:$0xff]   ;;  %v1599_v57 = vld [vmem:[%s1980_s5 + $0xa8] sm:$0xff]  }
  0x1a   : > { %622 = vmatprep.subr.bf16.mxu0 %v1557_v21  ;;  %665 = vmatprep.subr.bf16.mxu1 %v1559_v22  ;;  %v1595_v53 = vld [vmem:[%s1980_s5 + $0xa0] sm:$0xff]   ;;  %v1600_v58 = vld [vmem:[%s1980_s5 + $0x70] sm:$0xff]   ;;  %v1604_v62 = vld [vmem:[%s1980_s5 + $0x78] sm:$0xff]  }
  0x1b   : > { %v1601_v59 = vld [vmem:[%s1980_s5 + $0xf0] sm:$0xff]   ;;  %v1605_v63 = vld [vmem:[%s1980_s5 + $0xf8] sm:$0xff]   ;;  %v424_v7 = vld [vmem:[%s378_s29] sm:$0xf] }
  0x1c   : > { %v1602_v60 = vld [vmem:[%s1980_s5 + $0x30] sm:$0xff]   ;;  %v1606_v0 = vld [vmem:[%s1980_s5 + $0x38] sm:$0xff]   ;;  %v698_v10 = vld [vmem:[%s1978_s3] sm:$0xf]  ;;  %v429_v11 = vrot.slane %v424_v7, %v428_v5  ;;  %v437_v12 = vrot.slane %v424_v7, %v436_v6  ;;  %v433_v14 = vrot.slane %v424_v7, %v432_v8  ;;  %v441_v15 = vrot.slane %v424_v7, %v440_v9 }
  0x1d   : > { %623 = vmatpush1.bf16.msra.mxu0 %v1561_v23  ;;  %666 = vmatpush1.bf16.msra.mxu1 %v1562_v24  ;;  %v1603_v61 = vld [vmem:[%s1980_s5 + $0xb0] sm:$0xff]   ;;  %v1607_v1 = vld [vmem:[%s1980_s5 + $0xb8] sm:$0xff]   ;;  %v728_v13 = vld [vmem:[%s1979_s4] sm:$0xf]  ;;  %v703_v16 = vrot.slane %v698_v10, %v428_v5  ;;  %v711_v17 = vrot.slane %v698_v10, %v436_v6  ;;  %v707_v20 = vrot.slane %v698_v10, %v432_v8 }
  0x1e   : > { %624 = vmatprep.subr.bf16.mxu0 %v1563_v25  ;;  %667 = vmatprep.subr.bf16.mxu1 %v1565_v26  ;;  %v715_v21 = vrot.slane %v698_v10, %v440_v9  ;;  %v733_v23 = vrot.slane %v728_v13, %v428_v5  ;;  %v741_v25 = vrot.slane %v728_v13, %v436_v6  ;;  %v1608_v5 = vld [vmem:[%s1983_s8] sm:$0xff]   ;;  %v1609_v6 = vld [vmem:[%s1983_s8 + $0x8] sm:$0xff]   ;;  %v1610_v7 = vld [vmem:[%s1983_s8 + $0x10] sm:$0xff]  }
  0x1f   : > { %v1613_v10 = vld [vmem:[%s1983_s8 + $0x28] sm:$0xff]  }
  0x21   : > { %625 = vmatpush1.bf16.msra.mxu0 %v1567_v27  ;;  %668 = vmatpush1.bf16.msra.mxu1 %v1568_v28 }
  0x22   : > { %626 = vmatprep.subr.bf16.mxu0 %v1569_v29  ;;  %669 = vmatprep.subr.bf16.mxu1 %v1571_v30  ;;  %v737_v29 = vrot.slane %v728_v13, %v432_v8  ;;  %v1611_v8 = vld [vmem:[%s1983_s8 + $0x18] sm:$0xff]  }
  0x25   : > { %627 = vmatpush1.bf16.msra.mxu0 %v1573_v31  ;;  %670 = vmatpush1.bf16.msra.mxu1 %v1574_v32  ;;  %v745_v31 = vrot.slane %v728_v13, %v440_v9  ;;  %v1612_v9 = vld [vmem:[%s1983_s8 + $0x20] sm:$0xff]  }
  0x26   : > { %1427 = vmatprep.subr.bf16.mxu0 %v1576_v33  ;;  %1449 = vmatprep.subr.bf16.mxu1 %v1577_v35 }
  0x28   : > { %645 = vmatmul.mubr.bf16.vlgmr.msra.gmra.mrb[0].mxu0 %v1575_v34  ;;  %688 = vmatmul.mubr.bf16.vlgmr.msra.gmra.mrb[0].mxu1 %v1575_v34 }
  0x29   : > { %1428 = vmatpush3.bf16.msra.mxu0 %v1578_v36  ;;  %1450 = vmatpush3.bf16.msra.mxu1 %v1579_v37 }
  0x2a   : > { %1429 = vmatprep.subr.bf16.mxu0 %v1580_v38  ;;  %1451 = vmatprep.subr.bf16.mxu1 %v1581_v39 }
  0x2d   : > { %1430 = vmatpush3.bf16.msra.mxu0 %v1582_v40  ;;  %1452 = vmatpush3.bf16.msra.mxu1 %v1583_v41 }
  0x2e   : > { %1431 = vmatprep.subr.bf16.mxu0 %v1584_v42  ;;  %1453 = vmatprep.subr.bf16.mxu1 %v1585_v43 }
  0x31   : > { %1432 = vmatpush3.bf16.msra.mxu0 %v1586_v44  ;;  %1454 = vmatpush3.bf16.msra.mxu1 %v1587_v45 }
  0x32   : > { %1433 = vmatprep.subr.bf16.mxu0 %v1588_v46  ;;  %1455 = vmatprep.subr.bf16.mxu1 %v1589_v47 }
  0x35   : > { %1434 = vmatpush3.bf16.msra.mxu0 %v1590_v48  ;;  %1456 = vmatpush3.bf16.msra.mxu1 %v1591_v49 }
  0x36   : > { %1435 = vmatprep.subr.bf16.mxu0 %v1592_v50  ;;  %1457 = vmatprep.subr.bf16.mxu1 %v1593_v51 }
  0x39   : > { %1436 = vmatpush3.bf16.msra.mxu0 %v1594_v52  ;;  %1458 = vmatpush3.bf16.msra.mxu1 %v1595_v53 }
  0x3a   : > { %1437 = vmatprep.subr.bf16.mxu0 %v1596_v54  ;;  %1459 = vmatprep.subr.bf16.mxu1 %v1597_v55 }
  0x3d   : > { %1438 = vmatpush3.bf16.msra.mxu0 %v1598_v56  ;;  %1460 = vmatpush3.bf16.msra.mxu1 %v1599_v57 }
  0x3e   : > { %1439 = vmatprep.subr.bf16.mxu0 %v1600_v58  ;;  %1461 = vmatprep.subr.bf16.mxu1 %v1601_v59 }
  0x41   : > { %1440 = vmatpush3.bf16.msra.mxu0 %v1602_v60  ;;  %1462 = vmatpush3.bf16.msra.mxu1 %v1603_v61 }
  0x42   : > { %1441 = vmatprep.subr.bf16.mxu0 %v1604_v62  ;;  %1463 = vmatprep.subr.bf16.mxu1 %v1605_v63 }
  0x45   : > { %1442 = vmatpush3.bf16.msra.mxu0 %v1606_v0  ;;  %1464 = vmatpush3.bf16.msra.mxu1 %v1607_v1 }
  0x46   : > { %1480 = vmatprep.subr.bf16.mxu0 %v1641_v2 }
  0xfb   : > { %v646_v18 = vpop.f32.mrb[0].mxu0  ;;  %v689_v19 = vpop.f32.mrb[0].mxu1 }
  0xfc   : > { %v647_v22 = vadd.f32 %v646_v18, %v429_v11  ;;  %v690_v24 = vadd.f32 %v689_v19, %v437_v12  ;;  %v648_v26 = vpop.f32.mrb[1].mxu0  ;;  %v691_v27 = vpop.f32.mrb[1].mxu1 }
  0xfd   : > { %v649_v28 = vadd.f32 %v648_v26, %v433_v14  ;;  %v692_v30 = vadd.f32 %v691_v27, %v441_v15  ;;  %v650_v32 = vpop.f32.mrb[2].mxu0  ;;  %v693_v33 = vpop.f32.mrb[2].mxu1 }
  0xfe   : > { %v720_v34 = vmul.f32 %v703_v16, %v647_v22  ;;  %v722_v35 = vmul.f32 %v711_v17, %v690_v24  ;;  %v651_v36 = vadd.f32 %v650_v32, %v429_v11  ;;  %v694_v37 = vadd.f32 %v693_v33, %v437_v12  ;;  %v652_v38 = vpop.f32.mrb[3].mxu0  ;;  %v695_v39 = vpop.f32.mrb[3].mxu1  ;;  %v1614_v11 = vld [vmem:[%s1983_s8 + $0x30] sm:$0xff]   ;;  %v1615_v12 = vld [vmem:[%s1983_s8 + $0x38] sm:$0xff]  }
  0xff   : > { %v721_v40 = vmul.f32 %v707_v20, %v649_v28  ;;  %v723_v41 = vmul.f32 %v715_v21, %v692_v30  ;;  %v653_v42 = vadd.f32 %v652_v38, %v433_v14  ;;  %v696_v43 = vadd.f32 %v695_v39, %v441_v15 }
 0x100   : > { %v750_v44 = vadd.f32 %v733_v23, %v720_v34  ;;  %v752_v45 = vadd.f32 %v741_v25, %v722_v35  ;;  %v724_v46 = vmul.f32 %v703_v16, %v651_v36  ;;  %v726_v47 = vmul.f32 %v711_v17, %v694_v37 }
 0x101   : > { %v751_v48 = vadd.f32 %v737_v29, %v721_v40  ;;  %v753_v49 = vadd.f32 %v745_v31, %v723_v41  ;;  %v725_v50 = vmul.f32 %v707_v20, %v653_v42  ;;  %v727_v51 = vmul.f32 %v715_v21, %v696_v43  ;;  %v1413_v21 = vld [vmem:[%s1981_s6] ss:$0 sm:$0xff] }
 0x102   : > { %v754_v52 = vadd.f32 %v733_v23, %v724_v46  ;;  %v756_v53 = vadd.f32 %v741_v25, %v726_v47  ;;  %v758_v56 = vmax.f32 %v750_v44, 0.0  ;;  %v760_v57 = vmax.f32 %v752_v45, 0.0 }
 0x103   : > { %v755_v54 = vadd.f32 %v737_v29, %v725_v50  ;;  %v757_v55 = vadd.f32 %v745_v31, %v727_v51  ;;  %v759_v60 = vmax.f32 %v751_v48, 0.0  ;;  %v761_v61 = vmax.f32 %v753_v49, 0.0 }
 0x104   : > { %v762_v58 = vmax.f32 %v754_v52, 0.0  ;;  %v764_v59 = vmax.f32 %v756_v53, 0.0 }
 0x105   : > { %v763_v62 = vmax.f32 %v755_v54, 0.0  ;;  %v765_v63 = vmax.f32 %v757_v55, 0.0 }
 0x106   : > { %v766_v0 = vpack.c.bf16 %v762_v58, %v758_v56  ;;  %v768_v1 = vpack.c.bf16 %v764_v59, %v760_v57 }
 0x107   : > { %v767_v3 = vpack.c.bf16 %v763_v62, %v759_v60  ;;  %v769_v4 = vpack.c.bf16 %v765_v63, %v761_v61 }
 0x109   : > { %1058 = vmatprep.mubr.bf16.mxu0 %v767_v3  ;;  %1099 = vmatprep.mubr.bf16.mxu1 %v769_v4 }
 0x10a   : > { %1059 = vmatmul.mubr.bf16.vlgmr.msra.gmra.mrb[4].mxu0 %v766_v0  ;;  %1100 = vmatmul.mubr.bf16.vlgmr.msra.gmra.mrb[4].mxu1 %v768_v1 }
 0x10b   : > { %1481 = vmatpush3.bf16.msra.mxu0 %v1608_v5  ;;  %1496 = vmatprep.mubr.msk.bf16.mxu0 %vm1642_vm0, %v1641_v2 }
 0x10c   : > { %1482 = vmatprep.subr.bf16.mxu0 %v1641_v2 }
 0x10f   : > { %1483 = vmatpush3.bf16.msra.mxu0 %v1609_v6 }
 0x110   : > { %1484 = vmatprep.subr.bf16.mxu0 %v1641_v2 }
 0x113   : > { %1485 = vmatpush3.bf16.msra.mxu0 %v1610_v7 }
 0x114   : > { %1486 = vmatprep.subr.bf16.mxu0 %v1641_v2 }
 0x117   : > { %1487 = vmatpush3.bf16.msra.mxu0 %v1611_v8 }
 0x118   : > { %1488 = vmatprep.subr.bf16.mxu0 %v1641_v2 }
 0x11b   : > { %1489 = vmatpush3.bf16.msra.mxu0 %v1612_v9 }
 0x11c   : > { %1490 = vmatprep.subr.bf16.mxu0 %v1641_v2 }
 0x11f   : > { %1491 = vmatpush3.bf16.msra.mxu0 %v1613_v10 }
 0x120   : > { %1492 = vmatprep.subr.bf16.mxu0 %v1641_v2 }
 0x123   : > { %1493 = vmatpush3.bf16.msra.mxu0 %v1614_v11 }
 0x124   : > { %1494 = vmatprep.subr.bf16.mxu0 %v1641_v2  ;;  %v1414_v2 = vld [vmem:[%s1982_s7] ss:$0 sm:$0xff] }
 0x127   : > { %1495 = vmatpush3.bf16.msra.mxu0 %v1615_v12 }
 0x1dd   : > { %v1443_v13 = vpop.f32.mrb[4].mxu0  ;;  %v1465_v14 = vpop.f32.mrb[4].mxu1 }
 0x1de   : > { %v1444_v15 = vpop.f32.mrb[5].mxu0  ;;  %v1466_v16 = vpop.f32.mrb[5].mxu1 }
 0x1df   : > { %v1445_v17 = vadd.f32 %v1444_v15, %v1443_v13  ;;  %v1467_v18 = vadd.f32 %v1466_v16, %v1465_v14  ;;  %v1446_v19 = vpop.f32.mrb[6].mxu0  ;;  %v1468_v20 = vpop.f32.mrb[6].mxu1 }
 0x1e0   : > { %v1447_v22 = vpop.f32.mrb[7].mxu0  ;;  %v1469_v23 = vpop.f32.mrb[7].mxu1 }
 0x1e1   : > { %v1102_v24 = vadd.f32 %v1467_v18, %v1445_v17  ;;  %v1448_v25 = vadd.f32 %v1447_v22, %v1446_v19  ;;  %v1470_v26 = vadd.f32 %v1469_v23, %v1468_v20 }
 0x1e3   : > { %v1115_v27 = vmul.f32 %v1413_v21, %v1102_v24  ;;  %v1105_v28 = vadd.f32 %v1470_v26, %v1448_v25 }
 0x1e5   : > { %v1124_v29 = vadd.f32 %v1414_v2, %v1115_v27  ;;  %v1116_v30 = vmul.f32 %v1413_v21, %v1105_v28 }
 0x1e7   : > { %v1125_v31 = vadd.f32 %v1414_v2, %v1116_v30  ;;  %v1126_v32 = vmax.f32 %v1124_v29, 0.0 }
 0x1e9   : > { %v1127_v33 = vmax.f32 %v1125_v31, 0.0 }
 0x1eb   : > { %v1128_v34 = vpack.c.bf16 %v1127_v33, %v1126_v32 }
 0x1ed   : > { %1497 = vmatmul.mubr.bf16.vlgmr.msra.gmra.mrb[8].mxu0 %v1128_v34 }
 0x2c0   : > { %v1227_v35 = vpop.f32.mrb[8].mxu0 }
 0x2c1   : > { %v1234_v36 = vmax.f32 %v1227_v35, 0.0  ;;  %v1498_v37 = vpop.f32.mrb[9].mxu0 }
 0x2c2   : > { %v1230_v38 = vpop.f32.mrb[10].mxu0 }
 0x2c3   : > { %1237 = vst.msk [vmem:[%s387_s15] sm:$0xff] %vm1236_vm1, %v1234_v36  ;;  %v1235_v39 = vmax.f32 %v1230_v38, 0.0  ;;  %v1499_v40 = vpop.f32.mrb[11].mxu0 }
 0x2c5   : > { %1238 = vst.msk [vmem:[%s387_s15 + $0x8] sm:$0xff] %vm1236_vm1, %v1235_v39 }
 0x2c6 PF: > { %s19_s11 = sadd.s32 1, %s1638_s11   ;;  %s1985_s30 = smov %s1634_s10 }
 0x2c7   : > { %p16_p5 = scmp.ge.s32.totalorder %s19_s11, 4   ;;  %s1986_s10 = smov %s1988_s12 }
 0x2c9   :  { %18 = sbr.rel (!%p16_p5) target bundleno = 2 (0x2), region = 89 }

// kernel: dgcnn_seg_forward.10
= control target key start
LH: loop header
LB: loop body
LE: loop exit
PB: predicated region body
PF: predicated region fallthrough
CT: control target
= control target key end

     0   :  { %s3911_s18 = smov 0   ;;  %s3913_s19 = smov 0   ;;  %s5031_s0 = inlined_call_operand.vmem [shape: bf16[2,16,128], index: 0, kind: input, shape index: {}]   ;;  %s5032_s1 = inlined_call_operand.vmem [shape: bf16[128,1024], index: 1, kind: input, shape index: {}]   ;;  %s5033_s2 = inlined_call_operand.vmem [shape: f32[1,1024], index: 2, kind: input, shape index: {}]   ;;  %s5034_s3 = inlined_call_operand.vmem [shape: f32[1,1024], index: 3, kind: input, shape index: {}]   ;;  %s5035_s4 = inlined_call_operand.vmem [shape: bf16[1024,512], index: 4, kind: input, shape index: {}]   ;;  %s5036_s5 = inlined_call_operand.vmem [shape: f32[2,1,512], index: 5, kind: output, shape index: {}]  }
   0x1   :  { %s3915_s20 = smov 0  }
   0x2 LB: > { %s27_s21 = sadd.s32 1, %s3873_s19  ;;  %p3092_p0 = scmp.ge.s32.totalorder %s3877_s20, 1  ;;  %s3877_s20 = sphi %s3915_s20, %s15_s20   ;;  %s3873_s19 = sphi %s3913_s19, %s5038_s19   ;;  %s3869_s18 = sphi %s3911_s18, %s5037_s18  }
   0x3   : > { %p29_p1 = scmp.ge.s32.totalorder %s27_s21, 2  ;;  %p206_p2 = scmp.lt.s32.totalorder %s3877_s20, 3 }
   0x5   : > { %s5040_s21 = smov (%p29_p1, %s27_s21), 0  ;;  %p207_p3 = pnand %p3092_p0, %p206_p2 }
   0x6   : > { %v259_v0 = vld [vmem:[%s5032_s1] sm:$0xff] (!%p207_p3)  ;;  %v260_v2 = vld [vmem:[%s5032_s1 + $0x8] sm:$0xff] (!%p207_p3)  ;;  %p238_p4 = scmp.lt.s32.totalorder (!%p207_p3), %s3869_s18, 1  ;;  %v3879_v8 = vmov (!%p207_p3), 0   ;;  %v261_v60 = vld [vmem:[%s5032_s1 + $0x10] sm:$0xff] (!%p207_p3) }
   0x7   : > { %210 = sbr.rel (%p207_p3) target bundleno = 739 (0x2e3), region = 40  ;;  %v263_v1 = vld [vmem:[%s5032_s1 + $0x20] sm:$0xff] (!%p207_p3)  ;;  %v264_v4 = vld [vmem:[%s5032_s1 + $0x28] sm:$0xff] (!%p207_p3)  ;;  %681 = vmatprep.mubr.bf16.mxu0 (!%p207_p3), %v3879_v8  ;;  %724 = vmatprep.mubr.bf16.mxu1 (!%p207_p3), %v3879_v8  ;;  %v265_v61 = vld [vmem:[%s5032_s1 + $0x30] sm:$0xff] (!%p207_p3) }
   0x8   : > { %v3098_v3 = vcombine.high (!%p207_p3), %v259_v0, %v263_v1  ;;  %v3097_v5 = vcombine.low (!%p207_p3), %v259_v0, %v263_v1  ;;  %v267_v6 = vld [vmem:[%s5032_s1 + $0x40] sm:$0xff] (!%p207_p3)  ;;  %v3100_v9 = vcombine.high (!%p207_p3), %v260_v2, %v264_v4  ;;  %v3099_v10 = vcombine.low (!%p207_p3), %v260_v2, %v264_v4  ;;  %v268_v12 = vld [vmem:[%s5032_s1 + $0x48] sm:$0xff] (!%p207_p3)  ;;  %v262_v0 = vld [vmem:[%s5032_s1 + $0x18] sm:$0xff] (!%p207_p3) }
   0x9   : > { %v271_v7 = vld [vmem:[%s5032_s1 + $0x60] sm:$0xff] (!%p207_p3)  ;;  %v272_v13 = vld [vmem:[%s5032_s1 + $0x68] sm:$0xff] (!%p207_p3)  ;;  %v266_v1 = vld [vmem:[%s5032_s1 + $0x38] sm:$0xff] (!%p207_p3) }
   0xa   : > { %v3106_v11 = vcombine.high (!%p207_p3), %v267_v6, %v271_v7  ;;  %v275_v14 = vld [vmem:[%s5032_s1 + $0x80] sm:$0xff] (!%p207_p3)  ;;  %649 = vmatprep.subr.bf16.mxu0 (!%p207_p3), %v3098_v3  ;;  %v3108_v15 = vcombine.high (!%p207_p3), %v268_v12, %v272_v13  ;;  %v276_v17 = vld [vmem:[%s5032_s1 + $0x88] sm:$0xff] (!%p207_p3)  ;;  %692 = vmatprep.subr.bf16.mxu1 (!%p207_p3), %v3100_v9  ;;  %v3105_v19 = vcombine.low (!%p207_p3), %v267_v6, %v271_v7  ;;  %v269_v4 = vld [vmem:[%s5032_s1 + $0x50] sm:$0xff] (!%p207_p3) }
   0xb   : > { %v279_v16 = vld [vmem:[%s5032_s1 + $0xa0] sm:$0xff] (!%p207_p3)  ;;  %v280_v18 = vld [vmem:[%s5032_s1 + $0xa8] sm:$0xff] (!%p207_p3)  ;;  %650 = vmatpush1.bf16.msra.mxu0 (!%p207_p3), %v3097_v5  ;;  %693 = vmatpush1.bf16.msra.mxu1 (!%p207_p3), %v3099_v10  ;;  %v3107_v20 = vcombine.low (!%p207_p3), %v268_v12, %v272_v13  ;;  %v273_v5 = vld [vmem:[%s5032_s1 + $0x70] sm:$0xff] (!%p207_p3)  ;;  %v3102_v9 = vcombine.high (!%p207_p3), %v261_v60, %v265_v61  ;;  %v3104_v12 = vcombine.high (!%p207_p3), %v262_v0, %v266_v1 }
   0xc   : > { %651 = vmatprep.subr.bf16.mxu0 (!%p207_p3), %v3106_v11  ;;  %v3114_v21 = vcombine.high (!%p207_p3), %v275_v14, %v279_v16  ;;  %694 = vmatprep.subr.bf16.mxu1 (!%p207_p3), %v3108_v15  ;;  %v3116_v22 = vcombine.high (!%p207_p3), %v276_v17, %v280_v18  ;;  %v283_v23 = vld [vmem:[%s5032_s1 + $0xc0] sm:$0xff] (!%p207_p3)  ;;  %v284_v25 = vld [vmem:[%s5032_s1 + $0xc8] sm:$0xff] (!%p207_p3)  ;;  %v3113_v27 = vcombine.low (!%p207_p3), %v275_v14, %v279_v16  ;;  %v270_v10 = vld [vmem:[%s5032_s1 + $0x58] sm:$0xff] (!%p207_p3) }
   0xd   : > { %v287_v24 = vld [vmem:[%s5032_s1 + $0xe0] sm:$0xff] (!%p207_p3)  ;;  %v288_v26 = vld [vmem:[%s5032_s1 + $0xe8] sm:$0xff] (!%p207_p3)  ;;  %v3115_v28 = vcombine.low (!%p207_p3), %v276_v17, %v280_v18  ;;  %v274_v11 = vld [vmem:[%s5032_s1 + $0x78] sm:$0xff] (!%p207_p3)  ;;  %v3101_v13 = vcombine.low (!%p207_p3), %v261_v60, %v265_v61  ;;  %v3103_v16 = vcombine.low (!%p207_p3), %v262_v0, %v266_v1  ;;  %v3110_v17 = vcombine.high (!%p207_p3), %v269_v4, %v273_v5 }
   0xe   : > { %s5042_s18 = smov (!%p238_p4, %s3869_s18), 1  ;;  %v3122_v29 = vcombine.high %v283_v23, %v287_v24  ;;  %v3124_v30 = vcombine.high %v284_v25, %v288_v26  ;;  %v291_v31 = vld [vmem:[%s5032_s1 + $0x100] sm:$0xff]  ;;  %v292_v33 = vld [vmem:[%s5032_s1 + $0x108] sm:$0xff]  ;;  %v3121_v35 = vcombine.low %v283_v23, %v287_v24  ;;  %v3123_v36 = vcombine.low %v284_v25, %v288_v26  ;;  %v277_v14 = vld [vmem:[%s5032_s1 + $0x90] sm:$0xff] }
   0xf   : > { %s3419_s29 = sshll.u32 %s5042_s18, 3  ;;  %652 = vmatpush1.bf16.msra.mxu0 %v3105_v19  ;;  %695 = vmatpush1.bf16.msra.mxu1 %v3107_v20  ;;  %v295_v32 = vld [vmem:[%s5032_s1 + $0x120] sm:$0xff]  ;;  %v296_v34 = vld [vmem:[%s5032_s1 + $0x128] sm:$0xff]  ;;  %v281_v15 = vld [vmem:[%s5032_s1 + $0xb0] sm:$0xff]  ;;  %v3112_v20 = vcombine.high %v270_v10, %v274_v11  ;;  %v3111_v24 = vcombine.low %v270_v10, %v274_v11  ;;  %s3095_s17 = sshll.u32 %s5042_s18, 2 }
  0x10   : > { %653 = vmatprep.subr.bf16.mxu0 %v3114_v21  ;;  %s3986_s11 = scalar_lea.vmem %s5031_s0, %s3419_s29  ;;  %696 = vmatprep.subr.bf16.mxu1 %v3116_v22  ;;  %v3130_v37 = vcombine.high %v291_v31, %v295_v32  ;;  %v3132_v38 = vcombine.high %v292_v33, %v296_v34  ;;  %v299_v39 = vld [vmem:[%s5032_s1 + $0x140] sm:$0xff]  ;;  %v300_v41 = vld [vmem:[%s5032_s1 + $0x148] sm:$0xff]  ;;  %v3129_v43 = vcombine.low %v291_v31, %v295_v32  ;;  %v278_v18 = vld [vmem:[%s5032_s1 + $0x98] sm:$0xff]  ;;  %s250_s24 = scalar_lea.vmem %s5036_s5, %s3095_s17 }
  0x11   : > { %v303_v40 = vld [vmem:[%s5032_s1 + $0x160] sm:$0xff]  ;;  %v304_v42 = vld [vmem:[%s5032_s1 + $0x168] sm:$0xff]  ;;  %v3131_v44 = vcombine.low %v292_v33, %v296_v34  ;;  %v282_v19 = vld [vmem:[%s5032_s1 + $0xb8] sm:$0xff]  ;;  %v3109_v21 = vcombine.low %v269_v4, %v273_v5  ;;  %v3118_v25 = vcombine.high %v277_v14, %v281_v15 }
  0x12   : > { %v3138_v45 = vcombine.high %v299_v39, %v303_v40  ;;  %v3140_v46 = vcombine.high %v300_v41, %v304_v42  ;;  %v307_v47 = vld [vmem:[%s5032_s1 + $0x180] sm:$0xff]  ;;  %v308_v49 = vld [vmem:[%s5032_s1 + $0x188] sm:$0xff]  ;;  %v3137_v51 = vcombine.low %v299_v39, %v303_v40  ;;  %v3139_v52 = vcombine.low %v300_v41, %v304_v42  ;;  %v285_v22 = vld [vmem:[%s5032_s1 + $0xd0] sm:$0xff] }
  0x13   : > { %654 = vmatpush1.bf16.msra.mxu0 %v3113_v27  ;;  %697 = vmatpush1.bf16.msra.mxu1 %v3115_v28  ;;  %v311_v48 = vld [vmem:[%s5032_s1 + $0x1a0] sm:$0xff]  ;;  %v312_v50 = vld [vmem:[%s5032_s1 + $0x1a8] sm:$0xff]  ;;  %v289_v23 = vld [vmem:[%s5032_s1 + $0xf0] sm:$0xff]  ;;  %v3120_v28 = vcombine.high %v278_v18, %v282_v19  ;;  %v3119_v32 = vcombine.low %v278_v18, %v282_v19 }
  0x14   : > { %655 = vmatprep.subr.bf16.mxu0 %v3122_v29  ;;  %698 = vmatprep.subr.bf16.mxu1 %v3124_v30  ;;  %v3146_v53 = vcombine.high %v307_v47, %v311_v48  ;;  %v315_v54 = vld [vmem:[%s5032_s1 + $0x1c0] sm:$0xff]  ;;  %v316_v56 = vld [vmem:[%s5032_s1 + $0x1c8] sm:$0xff]  ;;  %v3148_v57 = vcombine.high %v308_v49, %v312_v50  ;;  %v3145_v59 = vcombine.low %v307_v47, %v311_v48  ;;  %v286_v26 = vld [vmem:[%s5032_s1 + $0xd8] sm:$0xff] }
  0x15   : > { %v319_v55 = vld [vmem:[%s5032_s1 + $0x1e0] sm:$0xff]  ;;  %v320_v58 = vld [vmem:[%s5032_s1 + $0x1e8] sm:$0xff]  ;;  %v3147_v62 = vcombine.low %v308_v49, %v312_v50  ;;  %v290_v27 = vld [vmem:[%s5032_s1 + $0xf8] sm:$0xff]  ;;  %v3117_v29 = vcombine.low %v277_v14, %v281_v15  ;;  %v3126_v33 = vcombine.high %v285_v22, %v289_v23 }
  0x16   : > { %v3154_v63 = vcombine.high %v315_v54, %v319_v55  ;;  %v3156_v2 = vcombine.high %v316_v56, %v320_v58  ;;  %v3153_v3 = vcombine.low %v315_v54, %v319_v55  ;;  %v3155_v6 = vcombine.low %v316_v56, %v320_v58  ;;  %v4055_v7 = vld [vmem:[%s3986_s11] sm:$0xff]   ;;  %v293_v30 = vld [vmem:[%s5032_s1 + $0x110] sm:$0xff]  ;;  %v294_v34 = vld [vmem:[%s5032_s1 + $0x118] sm:$0xff] }
  0x17   : > { %656 = vmatpush1.bf16.msra.mxu0 %v3121_v35  ;;  %699 = vmatpush1.bf16.msra.mxu1 %v3123_v36  ;;  %v297_v31 = vld [vmem:[%s5032_s1 + $0x130] sm:$0xff]  ;;  %v3128_v35 = vcombine.high %v286_v26, %v290_v27  ;;  %v3125_v36 = vcombine.low %v285_v22, %v289_v23  ;;  %v3127_v39 = vcombine.low %v286_v26, %v290_v27  ;;  %v302_v41 = vld [vmem:[%s5032_s1 + $0x158] sm:$0xff] }
  0x18   : > { %657 = vmatprep.subr.bf16.mxu0 %v3130_v37  ;;  %700 = vmatprep.subr.bf16.mxu1 %v3132_v38  ;;  %v301_v37 = vld [vmem:[%s5032_s1 + $0x150] sm:$0xff]  ;;  %v3134_v40 = vcombine.high %v293_v30, %v297_v31  ;;  %v306_v42 = vld [vmem:[%s5032_s1 + $0x178] sm:$0xff] }
  0x19   : > { %v305_v38 = vld [vmem:[%s5032_s1 + $0x170] sm:$0xff]  ;;  %v310_v49 = vld [vmem:[%s5032_s1 + $0x198] sm:$0xff]  ;;  %v3143_v55 = vcombine.low %v302_v41, %v306_v42 }
  0x1a   : > { %v3142_v48 = vcombine.high %v301_v37, %v305_v38  ;;  %v314_v50 = vld [vmem:[%s5032_s1 + $0x1b8] sm:$0xff]  ;;  %v321_v54 = vld [vmem:[%s5032_s1 + $0x1f0] sm:$0xff] }
  0x1b   : > { %658 = vmatpush1.bf16.msra.mxu0 %v3129_v43  ;;  %701 = vmatpush1.bf16.msra.mxu1 %v3131_v44  ;;  %v3133_v44 = vcombine.low %v293_v30, %v297_v31  ;;  %v322_v58 = vld [vmem:[%s5032_s1 + $0x1f8] sm:$0xff]  ;;  %v3151_v61 = vcombine.low %v310_v49, %v314_v50  ;;  %v3471_v4 = vld [vmem:[%s5035_s4] ss:$16 sps:$4 sm:$0xff]   ;;  %v3485_v11 = vld [vmem:[%s5035_s4 + $0x44] ss:$16 sps:$4 sm:$0xff]  }
  0x1c   : > { %659 = vmatprep.subr.bf16.mxu0 %v3138_v45  ;;  %702 = vmatprep.subr.bf16.mxu1 %v3140_v46  ;;  %v309_v45 = vld [vmem:[%s5032_s1 + $0x190] sm:$0xff]  ;;  %v3474_v5 = vld [vmem:[%s5035_s4 + $0x8] ss:$16 sps:$4 sm:$0xff]  }
  0x1d   : > { %v313_v46 = vld [vmem:[%s5032_s1 + $0x1b0] sm:$0xff]  ;;  %v3480_v10 = vld [vmem:[%s5035_s4 + $0x28] ss:$16 sps:$4 sm:$0xff]  }
  0x1e   : > { %v3150_v56 = vcombine.high %v309_v45, %v313_v46  ;;  %v3149_v60 = vcombine.low %v309_v45, %v313_v46  ;;  %v3486_v14 = vld [vmem:[%s5035_s4 + $0x48] ss:$16 sps:$4 sm:$0xff]   ;;  %v3491_v15 = vld [vmem:[%s5035_s4 + $0x64] ss:$16 sps:$4 sm:$0xff]  }
  0x1f   : > { %660 = vmatpush1.bf16.msra.mxu0 %v3137_v51  ;;  %703 = vmatpush1.bf16.msra.mxu1 %v3139_v52  ;;  %v3144_v51 = vcombine.high %v302_v41, %v306_v42  ;;  %v3141_v52 = vcombine.low %v301_v37, %v305_v38  ;;  %v3492_v18 = vld [vmem:[%s5035_s4 + $0x68] ss:$16 sps:$4 sm:$0xff]   ;;  %v3497_v19 = vld [vmem:[%s5035_s4 + $0x84] ss:$16 sps:$4 sm:$0xff]  }
  0x20   : > { %661 = vmatprep.subr.bf16.mxu0 %v3146_v53  ;;  %704 = vmatprep.subr.bf16.mxu1 %v3148_v57  ;;  %v317_v53 = vld [vmem:[%s5032_s1 + $0x1d0] sm:$0xff]  ;;  %v318_v57 = vld [vmem:[%s5032_s1 + $0x1d8] sm:$0xff] }
  0x21   : > { %v3157_v0 = vcombine.low %v317_v53, %v321_v54  ;;  %v3159_v1 = vcombine.low %v318_v57, %v322_v58  ;;  %v3498_v22 = vld [vmem:[%s5035_s4 + $0x88] ss:$16 sps:$4 sm:$0xff]   ;;  %v3503_v23 = vld [vmem:[%s5035_s4 + $0xa4] ss:$16 sps:$4 sm:$0xff]  }
  0x22   : > { %v3504_v26 = vld [vmem:[%s5035_s4 + $0xa8] ss:$16 sps:$4 sm:$0xff]   ;;  %v3509_v27 = vld [vmem:[%s5035_s4 + $0xc4] ss:$16 sps:$4 sm:$0xff]  }
  0x23   : > { %662 = vmatpush1.bf16.msra.mxu0 %v3145_v59  ;;  %705 = vmatpush1.bf16.msra.mxu1 %v3147_v62  ;;  %v3152_v59 = vcombine.high %v310_v49, %v314_v50  ;;  %v3158_v62 = vcombine.high %v317_v53, %v321_v54  ;;  %v3510_v30 = vld [vmem:[%s5035_s4 + $0xc8] ss:$16 sps:$4 sm:$0xff]   ;;  %v3515_v31 = vld [vmem:[%s5035_s4 + $0xe4] ss:$16 sps:$4 sm:$0xff]  }
  0x24   : > { %663 = vmatprep.subr.bf16.mxu0 %v3154_v63  ;;  %706 = vmatprep.subr.bf16.mxu1 %v3156_v2  ;;  %v3160_v63 = vcombine.high %v318_v57, %v322_v58  ;;  %v3473_v2 = vld [vmem:[%s5035_s4 + $0x4] ss:$16 sps:$4 sm:$0xff]   ;;  %v3522_v37 = vld [vmem:[%s5035_s4 + $0x108] ss:$16 sps:$4 sm:$0xff]  }
  0x25   : > { %v3527_v38 = vld [vmem:[%s5035_s4 + $0x124] ss:$16 sps:$4 sm:$0xff]   ;;  %v3528_v41 = vld [vmem:[%s5035_s4 + $0x128] ss:$16 sps:$4 sm:$0xff]  }
  0x26   : > { %v3533_v42 = vld [vmem:[%s5035_s4 + $0x144] ss:$16 sps:$4 sm:$0xff]   ;;  %v3534_v45 = vld [vmem:[%s5035_s4 + $0x148] ss:$16 sps:$4 sm:$0xff]  }
  0x27   : > { %664 = vmatpush1.bf16.msra.mxu0 %v3153_v3  ;;  %707 = vmatpush1.bf16.msra.mxu1 %v3155_v6  ;;  %v3476_v3 = vld [vmem:[%s5035_s4 + $0xc] ss:$16 sps:$4 sm:$0xff]   ;;  %v3479_v6 = vld [vmem:[%s5035_s4 + $0x24] ss:$16 sps:$4 sm:$0xff]   ;;  %v3540_v49 = vld [vmem:[%s5035_s4 + $0x168] ss:$16 sps:$4 sm:$0xff]  }
  0x28   : > { %735 = vmatprep.subr.bf16.mxu0 %v3102_v9  ;;  %778 = vmatprep.subr.bf16.mxu1 %v3104_v12  ;;  %v3477_v9 = vld [vmem:[%s5035_s4 + $0x20] ss:$16 sps:$4 sm:$0xff]   ;;  %v3488_v12 = vld [vmem:[%s5035_s4 + $0x4c] ss:$16 sps:$4 sm:$0xff]   ;;  %v3539_v46 = vld [vmem:[%s5035_s4 + $0x164] ss:$16 sps:$4 sm:$0xff]  }
  0x29   : > { %v3545_v50 = vld [vmem:[%s5035_s4 + $0x184] ss:$16 sps:$4 sm:$0xff]   ;;  %v3546_v53 = vld [vmem:[%s5035_s4 + $0x188] ss:$16 sps:$4 sm:$0xff]  }
  0x2a   : > { %682 = vmatmul.mubr.bf16.vlgmr.msra.gmra.mrb[0].mxu0 %v4055_v7  ;;  %725 = vmatmul.mubr.bf16.vlgmr.msra.gmra.mrb[0].mxu1 %v4055_v7  ;;  %v3551_v54 = vld [vmem:[%s5035_s4 + $0x1a4] ss:$16 sps:$4 sm:$0xff]   ;;  %v3552_v57 = vld [vmem:[%s5035_s4 + $0x1a8] ss:$16 sps:$4 sm:$0xff]  }
  0x2b   : > { %736 = vmatpush1.bf16.msra.mxu0 %v3101_v13  ;;  %779 = vmatpush1.bf16.msra.mxu1 %v3103_v16  ;;  %v3483_v13 = vld [vmem:[%s5035_s4 + $0x40] ss:$16 sps:$4 sm:$0xff]   ;;  %v3494_v16 = vld [vmem:[%s5035_s4 + $0x6c] ss:$16 sps:$4 sm:$0xff]   ;;  %v3557_v58 = vld [vmem:[%s5035_s4 + $0x1c4] ss:$16 sps:$4 sm:$0xff]  }
  0x2c   : > { %737 = vmatprep.subr.bf16.mxu0 %v3110_v17  ;;  %780 = vmatprep.subr.bf16.mxu1 %v3112_v20  ;;  %v3489_v17 = vld [vmem:[%s5035_s4 + $0x60] ss:$16 sps:$4 sm:$0xff]   ;;  %v3500_v20 = vld [vmem:[%s5035_s4 + $0x8c] ss:$16 sps:$4 sm:$0xff]  }
  0x2d   : > { %767 = vmatprep.mubr.bf16.mxu0 %v3879_v8  ;;  %810 = vmatprep.mubr.bf16.mxu1 %v3879_v8  ;;  %v298_v8 = vld [vmem:[%s5032_s1 + $0x138] sm:$0xff] }
  0x2e   : > { %v3136_v43 = vcombine.high %v294_v34, %v298_v8  ;;  %v3135_v47 = vcombine.low %v294_v34, %v298_v8  ;;  %v3516_v34 = vld [vmem:[%s5035_s4 + $0xe8] ss:$16 sps:$4 sm:$0xff]   ;;  %v3521_v8 = vld [vmem:[%s5035_s4 + $0x104] ss:$16 sps:$4 sm:$0xff]  }
  0x2f   : > { %738 = vmatpush1.bf16.msra.mxu0 %v3109_v21  ;;  %781 = vmatpush1.bf16.msra.mxu1 %v3111_v24  ;;  %v3495_v21 = vld [vmem:[%s5035_s4 + $0x80] ss:$16 sps:$4 sm:$0xff]   ;;  %v3506_v24 = vld [vmem:[%s5035_s4 + $0xac] ss:$16 sps:$4 sm:$0xff]  }
  0x30   : > { %739 = vmatprep.subr.bf16.mxu0 %v3118_v25  ;;  %782 = vmatprep.subr.bf16.mxu1 %v3120_v28  ;;  %v3501_v25 = vld [vmem:[%s5035_s4 + $0xa0] ss:$16 sps:$4 sm:$0xff]   ;;  %v3512_v28 = vld [vmem:[%s5035_s4 + $0xcc] ss:$16 sps:$4 sm:$0xff]  }
  0x33   : > { %740 = vmatpush1.bf16.msra.mxu0 %v3117_v29  ;;  %783 = vmatpush1.bf16.msra.mxu1 %v3119_v32  ;;  %v3507_v29 = vld [vmem:[%s5035_s4 + $0xc0] ss:$16 sps:$4 sm:$0xff]   ;;  %v3518_v32 = vld [vmem:[%s5035_s4 + $0xec] ss:$16 sps:$4 sm:$0xff]  }
  0x34   : > { %741 = vmatprep.subr.bf16.mxu0 %v3126_v33  ;;  %784 = vmatprep.subr.bf16.mxu1 %v3128_v35  ;;  %v3513_v33 = vld [vmem:[%s5035_s4 + $0xe0] ss:$16 sps:$4 sm:$0xff]   ;;  %v3524_v35 = vld [vmem:[%s5035_s4 + $0x10c] ss:$16 sps:$4 sm:$0xff]  }
  0x37   : > { %742 = vmatpush1.bf16.msra.mxu0 %v3125_v36  ;;  %785 = vmatpush1.bf16.msra.mxu1 %v3127_v39  ;;  %v3519_v36 = vld [vmem:[%s5035_s4 + $0x100] ss:$16 sps:$4 sm:$0xff]   ;;  %v3530_v39 = vld [vmem:[%s5035_s4 + $0x12c] ss:$16 sps:$4 sm:$0xff]  }
  0x38   : > { %743 = vmatprep.subr.bf16.mxu0 %v3134_v40  ;;  %786 = vmatprep.subr.bf16.mxu1 %v3136_v43  ;;  %v3525_v40 = vld [vmem:[%s5035_s4 + $0x120] ss:$16 sps:$4 sm:$0xff]   ;;  %v3536_v43 = vld [vmem:[%s5035_s4 + $0x14c] ss:$16 sps:$4 sm:$0xff]  }
  0x3b   : > { %744 = vmatpush1.bf16.msra.mxu0 %v3133_v44  ;;  %787 = vmatpush1.bf16.msra.mxu1 %v3135_v47  ;;  %v3531_v44 = vld [vmem:[%s5035_s4 + $0x140] ss:$16 sps:$4 sm:$0xff]   ;;  %v3542_v47 = vld [vmem:[%s5035_s4 + $0x16c] ss:$16 sps:$4 sm:$0xff]  }
  0x3c   : > { %745 = vmatprep.subr.bf16.mxu0 %v3142_v48  ;;  %788 = vmatprep.subr.bf16.mxu1 %v3144_v51  ;;  %v3537_v48 = vld [vmem:[%s5035_s4 + $0x160] ss:$16 sps:$4 sm:$0xff]   ;;  %v3548_v51 = vld [vmem:[%s5035_s4 + $0x18c] ss:$16 sps:$4 sm:$0xff]  }
  0x3f   : > { %746 = vmatpush1.bf16.msra.mxu0 %v3141_v52  ;;  %789 = vmatpush1.bf16.msra.mxu1 %v3143_v55  ;;  %v3543_v52 = vld [vmem:[%s5035_s4 + $0x180] ss:$16 sps:$4 sm:$0xff]   ;;  %v3554_v55 = vld [vmem:[%s5035_s4 + $0x1ac] ss:$16 sps:$4 sm:$0xff]  }
  0x40   : > { %747 = vmatprep.subr.bf16.mxu0 %v3150_v56  ;;  %790 = vmatprep.subr.bf16.mxu1 %v3152_v59  ;;  %v3549_v56 = vld [vmem:[%s5035_s4 + $0x1a0] ss:$16 sps:$4 sm:$0xff]   ;;  %v3560_v59 = vld [vmem:[%s5035_s4 + $0x1cc] ss:$16 sps:$4 sm:$0xff]  }
  0x43   : > { %748 = vmatpush1.bf16.msra.mxu0 %v3149_v60  ;;  %791 = vmatpush1.bf16.msra.mxu1 %v3151_v61  ;;  %v3555_v60 = vld [vmem:[%s5035_s4 + $0x1c0] ss:$16 sps:$4 sm:$0xff]   ;;  %v3558_v61 = vld [vmem:[%s5035_s4 + $0x1c8] ss:$16 sps:$4 sm:$0xff]  }
  0x44   : > { %749 = vmatprep.subr.bf16.mxu0 %v3158_v62  ;;  %792 = vmatprep.subr.bf16.mxu1 %v3160_v63  ;;  %v3561_v62 = vld [vmem:[%s5035_s4 + $0x1e0] ss:$16 sps:$4 sm:$0xff]   ;;  %v3563_v63 = vld [vmem:[%s5035_s4 + $0x1e4] ss:$16 sps:$4 sm:$0xff]  }
  0x47   : > { %750 = vmatpush1.bf16.msra.mxu0 %v3157_v0  ;;  %793 = vmatpush1.bf16.msra.mxu1 %v3159_v1  ;;  %v3564_v0 = vld [vmem:[%s5035_s4 + $0x1e8] ss:$16 sps:$4 sm:$0xff]   ;;  %v3566_v1 = vld [vmem:[%s5035_s4 + $0x1ec] ss:$16 sps:$4 sm:$0xff]  }
  0x48   : > { %2659 = vmatprep.subr.bf16.mxu0 %v3473_v2  ;;  %2823 = vmatprep.subr.bf16.mxu1 %v3476_v3  ;;  %v3569_v2 = vld [vmem:[%s5035_s4 + $0x204] ss:$16 sps:$4 sm:$0xff]   ;;  %v3572_v3 = vld [vmem:[%s5035_s4 + $0x20c] ss:$16 sps:$4 sm:$0xff]  }
  0x4a   : > { %768 = vmatmul.mubr.bf16.vlgmr.msra.gmra.mrb[4].mxu0 %v4055_v7  ;;  %811 = vmatmul.mubr.bf16.vlgmr.msra.gmra.mrb[4].mxu1 %v4055_v7  ;;  %v3482_v7 = vld [vmem:[%s5035_s4 + $0x2c] ss:$16 sps:$4 sm:$0xff]  }
  0x4b   : > { %2660 = vmatpush1.bf16.msra.mxu0 %v3471_v4  ;;  %2824 = vmatpush1.bf16.msra.mxu1 %v3474_v5  ;;  %v823_v4 = vlaneseq }
  0x4c   : > { %2661 = vmatprep.subr.bf16.mxu0 %v3479_v6  ;;  %2825 = vmatprep.subr.bf16.mxu1 %v3482_v7  ;;  %v4348_v7 = vld [vmem:[%s5033_s2] sm:$0xff] }
  0x4d   : > { %v4340_v5 = vshrl.u32 %v823_v4, 7  ;;  %vm3018_vm0 = vcmp.lt.s32.totalorder %v823_v4, 512 }
  0x4f   : > { %2662 = vmatpush1.bf16.msra.mxu0 %v3477_v9  ;;  %2826 = vmatpush1.bf16.msra.mxu1 %v3480_v10  ;;  %v4343_v6 = vsub.s32 0, %v4340_v5  ;;  %v4351_v9 = vsub.s32 2, %v4340_v5  ;;  %v4354_v10 = vsub.s32 1, %v4340_v5 }
  0x50   : > { %2663 = vmatprep.subr.bf16.mxu0 %v3485_v11  ;;  %2827 = vmatprep.subr.bf16.mxu1 %v3488_v12  ;;  %v4357_v11 = vsub.s32 3, %v4340_v5  ;;  %v4362_v12 = vld [vmem:[%s5034_s3] sm:$0xff] }
  0x53   : > { %2664 = vmatpush1.bf16.msra.mxu0 %v3483_v13  ;;  %2828 = vmatpush1.bf16.msra.mxu1 %v3486_v14  ;;  %v826_v13 = vrot.slane %v4348_v7, %v4343_v6  ;;  %v834_v14 = vrot.slane %v4348_v7, %v4351_v9 }
  0x54   : > { %2665 = vmatprep.subr.bf16.mxu0 %v3491_v15  ;;  %2829 = vmatprep.subr.bf16.mxu1 %v3494_v16  ;;  %v830_v15 = vrot.slane %v4348_v7, %v4354_v10  ;;  %v884_v16 = vrot.slane %v4362_v12, %v4343_v6 }
  0x57   : > { %2666 = vmatpush1.bf16.msra.mxu0 %v3489_v17  ;;  %2830 = vmatpush1.bf16.msra.mxu1 %v3492_v18  ;;  %v838_v17 = vrot.slane %v4348_v7, %v4357_v11 }
  0x58   : > { %2667 = vmatprep.subr.bf16.mxu0 %v3497_v19  ;;  %2831 = vmatprep.subr.bf16.mxu1 %v3500_v20  ;;  %v892_v19 = vrot.slane %v4362_v12, %v4351_v9  ;;  %v888_v20 = vrot.slane %v4362_v12, %v4354_v10 }
  0x5b   : > { %2668 = vmatpush1.bf16.msra.mxu0 %v3495_v21  ;;  %2832 = vmatpush1.bf16.msra.mxu1 %v3498_v22 }
  0x5c   : > { %2669 = vmatprep.subr.bf16.mxu0 %v3503_v23  ;;  %2833 = vmatprep.subr.bf16.mxu1 %v3506_v24  ;;  %v896_v24 = vrot.slane %v4362_v12, %v4357_v11 }
  0x5f   : > { %2670 = vmatpush1.bf16.msra.mxu0 %v3501_v25  ;;  %2834 = vmatpush1.bf16.msra.mxu1 %v3504_v26 }
  0x60   : > { %2671 = vmatprep.subr.bf16.mxu0 %v3509_v27  ;;  %2835 = vmatprep.subr.bf16.mxu1 %v3512_v28 }
  0x63   : > { %2672 = vmatpush1.bf16.msra.mxu0 %v3507_v29  ;;  %2836 = vmatpush1.bf16.msra.mxu1 %v3510_v30 }
  0x64   : > { %2673 = vmatprep.subr.bf16.mxu0 %v3515_v31  ;;  %2837 = vmatprep.subr.bf16.mxu1 %v3518_v32 }
  0x67   : > { %2674 = vmatpush1.bf16.msra.mxu0 %v3513_v33  ;;  %2838 = vmatpush1.bf16.msra.mxu1 %v3516_v34 }
  0x68   : > { %2675 = vmatprep.subr.bf16.mxu0 %v3521_v8  ;;  %2839 = vmatprep.subr.bf16.mxu1 %v3524_v35 }
  0x6b   : > { %2676 = vmatpush1.bf16.msra.mxu0 %v3519_v36  ;;  %2840 = vmatpush1.bf16.msra.mxu1 %v3522_v37 }
  0x6c   : > { %2677 = vmatprep.subr.bf16.mxu0 %v3527_v38  ;;  %2841 = vmatprep.subr.bf16.mxu1 %v3530_v39 }
  0x6f   : > { %2678 = vmatpush1.bf16.msra.mxu0 %v3525_v40  ;;  %2842 = vmatpush1.bf16.msra.mxu1 %v3528_v41 }
  0x70   : > { %2679 = vmatprep.subr.bf16.mxu0 %v3533_v42  ;;  %2843 = vmatprep.subr.bf16.mxu1 %v3536_v43 }
  0x73   : > { %2680 = vmatpush1.bf16.msra.mxu0 %v3531_v44  ;;  %2844 = vmatpush1.bf16.msra.mxu1 %v3534_v45 }
  0x74   : > { %2681 = vmatprep.subr.bf16.mxu0 %v3539_v46  ;;  %2845 = vmatprep.subr.bf16.mxu1 %v3542_v47 }
  0x77   : > { %2682 = vmatpush1.bf16.msra.mxu0 %v3537_v48  ;;  %2846 = vmatpush1.bf16.msra.mxu1 %v3540_v49 }
  0x78   : > { %2683 = vmatprep.subr.bf16.mxu0 %v3545_v50  ;;  %2847 = vmatprep.subr.bf16.mxu1 %v3548_v51 }
  0x7b   : > { %2684 = vmatpush1.bf16.msra.mxu0 %v3543_v52  ;;  %2848 = vmatpush1.bf16.msra.mxu1 %v3546_v53 }
  0x7c   : > { %2685 = vmatprep.subr.bf16.mxu0 %v3551_v54  ;;  %2849 = vmatprep.subr.bf16.mxu1 %v3554_v55 }
  0x7f   : > { %2686 = vmatpush1.bf16.msra.mxu0 %v3549_v56  ;;  %2850 = vmatpush1.bf16.msra.mxu1 %v3552_v57 }
  0x80   : > { %2687 = vmatprep.subr.bf16.mxu0 %v3557_v58  ;;  %2851 = vmatprep.subr.bf16.mxu1 %v3560_v59 }
  0x83   : > { %2688 = vmatpush1.bf16.msra.mxu0 %v3555_v60  ;;  %2852 = vmatpush1.bf16.msra.mxu1 %v3558_v61 }
  0x84   : > { %2689 = vmatprep.subr.bf16.mxu0 %v3563_v63  ;;  %2853 = vmatprep.subr.bf16.mxu1 %v3566_v1  ;;  %v3880_v63 = vmov 1966171168  }
  0x87   : > { %2690 = vmatpush1.bf16.msra.mxu0 %v3561_v62  ;;  %2854 = vmatpush1.bf16.msra.mxu1 %v3564_v0  ;;  %v1023_v0 = vunpack.c.l.s4 %v3880_v63 }
  0x88   : > { %2700 = vmatprep.subr.bf16.mxu0 %v3569_v2  ;;  %2864 = vmatprep.subr.bf16.mxu1 %v3572_v3 }
  0xfd   : > { %v683_v18 = vpop.f32.mrb[0].mxu0  ;;  %v726_v22 = vpop.f32.mrb[0].mxu1 }
  0xfe   : > { %v863_v21 = vmul.f32 %v826_v13, %v683_v18  ;;  %v685_v23 = vpop.f32.mrb[1].mxu0  ;;  %v865_v25 = vmul.f32 %v834_v14, %v726_v22  ;;  %v728_v27 = vpop.f32.mrb[1].mxu1  ;;  %v1024_v18 = vunpack.c.0.s8 %v1023_v0 }
  0xff   : > { %v864_v26 = vmul.f32 %v830_v15, %v685_v23  ;;  %v687_v28 = vpop.f32.mrb[2].mxu0  ;;  %v866_v30 = vmul.f32 %v838_v17, %v728_v27  ;;  %v730_v32 = vpop.f32.mrb[2].mxu1 }
 0x100   : > { %v921_v29 = vadd.f32 %v884_v16, %v863_v21  ;;  %v871_v31 = vmul.f32 %v826_v13, %v687_v28  ;;  %v689_v33 = vpop.f32.mrb[3].mxu0  ;;  %v923_v34 = vadd.f32 %v892_v19, %v865_v25  ;;  %v873_v35 = vmul.f32 %v834_v14, %v730_v32  ;;  %v732_v37 = vpop.f32.mrb[3].mxu1 }
 0x101   : > { %v922_v8 = vadd.f32 %v888_v20, %v864_v26  ;;  %v872_v36 = vmul.f32 %v830_v15, %v689_v33  ;;  %v924_v39 = vadd.f32 %v896_v24, %v866_v30  ;;  %v874_v41 = vmul.f32 %v838_v17, %v732_v37 }
 0x102   : > { %v937_v38 = vmax.f32 %v921_v29, 0.0  ;;  %v929_v40 = vadd.f32 %v884_v16, %v871_v31  ;;  %v939_v42 = vmax.f32 %v923_v34, 0.0  ;;  %v931_v43 = vadd.f32 %v892_v19, %v873_v35 }
 0x103   : > { %v930_v44 = vadd.f32 %v888_v20, %v872_v36  ;;  %v932_v46 = vadd.f32 %v896_v24, %v874_v41  ;;  %v938_v47 = vmax.f32 %v922_v8, 0.0  ;;  %v940_v50 = vmax.f32 %v924_v39, 0.0 }
 0x104   : > { %v945_v45 = vmax.f32 %v929_v40, 0.0  ;;  %v947_v48 = vmax.f32 %v931_v43, 0.0  ;;  %v4381_v27 = vsub.s32 %v1024_v18, %v4340_v5  ;;  %v4384_v31 = vsub.s32 4, %v4340_v5 }
 0x105   : > { %v946_v49 = vmax.f32 %v930_v44, 0.0  ;;  %v948_v52 = vmax.f32 %v932_v46, 0.0  ;;  %v4390_v33 = vsub.s32 6, %v4340_v5  ;;  %v4393_v34 = vsub.s32 5, %v4340_v5 }
 0x106   : > { %v954_v51 = vmax.f32 %v937_v38, %v945_v45  ;;  %v968_v53 = vmax.f32 %v939_v42, %v947_v48  ;;  %v4399_v35 = vsub.s32 7, %v4340_v5  ;;  %v842_v37 = vrot.slane %v4348_v7, %v4384_v31 }
 0x107   : > { %v961_v54 = vmax.f32 %v938_v47, %v946_v49  ;;  %v975_v56 = vmax.f32 %v940_v50, %v948_v52  ;;  %v850_v38 = vrot.slane %v4348_v7, %v4390_v33  ;;  %v846_v39 = vrot.slane %v4348_v7, %v4393_v34 }
 0x108   : > { %v955_v55 = vrot.slane %v954_v51, 4  ;;  %v969_v57 = vrot.slane %v968_v53, 4  ;;  %v900_v40 = vrot.slane %v4362_v12, %v4384_v31  ;;  %v854_v41 = vrot.slane %v4348_v7, %v4399_v35 }
 0x109   : > { %v962_v58 = vrot.slane %v961_v54, 4  ;;  %v976_v60 = vrot.slane %v975_v56, 4  ;;  %v908_v42 = vrot.slane %v4362_v12, %v4390_v33  ;;  %v904_v43 = vrot.slane %v4362_v12, %v4393_v34 }
 0x10a   : > { %v956_v59 = vmax.f32 %v954_v51, %v955_v55  ;;  %v970_v61 = vmax.f32 %v968_v53, %v969_v57  ;;  %v912_v47 = vrot.slane %v4362_v12, %v4399_v35 }
 0x10b   : > { %v963_v62 = vmax.f32 %v961_v54, %v962_v58  ;;  %v977_v2 = vmax.f32 %v975_v56, %v976_v60 }
 0x10c   : > { %v957_v1 = vrot.slane %v956_v59, 2  ;;  %v971_v3 = vrot.slane %v970_v61, 2 }
 0x10d   : > { %v964_v13 = vrot.slane %v963_v62, 2  ;;  %v978_v15 = vrot.slane %v977_v2, 2 }
 0x10e   : > { %v958_v14 = vmax.f32 %v956_v59, %v957_v1  ;;  %v972_v16 = vmax.f32 %v970_v61, %v971_v3 }
 0x10f   : > { %v965_v17 = vmax.f32 %v963_v62, %v964_v13  ;;  %v979_v20 = vmax.f32 %v977_v2, %v978_v15 }
 0x110   : > { %v959_v19 = vrot.slane %v958_v14, 1  ;;  %v973_v21 = vrot.slane %v972_v16, 1 }
 0x111   : > { %v966_v22 = vrot.slane %v965_v17, 1  ;;  %v980_v24 = vrot.slane %v979_v20, 1 }
 0x112   : > { %v960_v23 = vmax.f32 %v958_v14, %v959_v19  ;;  %v974_v25 = vmax.f32 %v972_v16, %v973_v21 }
 0x113   : > { %v967_v26 = vmax.f32 %v965_v17, %v966_v22  ;;  %v981_v28 = vmax.f32 %v979_v20, %v980_v24 }
 0x115   : > { %v1018_v29 = vcombine.low %v960_v23, %v967_v26  ;;  %v1019_v30 = vcombine.low %v974_v25, %v981_v28 }
 0x117   : > { %v4387_v32 = vrot.slane %v1018_v29, %v4381_v27  ;;  %v4396_v8 = vrot.slane %v1019_v30, %v4381_v27 }
 0x119   : > { %v1050_v36 = vcombine.low %v4387_v32, %v4396_v8  ;;  %v3570_v32 = vld [vmem:[%s5035_s4 + $0x208] ss:$16 sps:$4 sm:$0xff]  }
 0x11d   : > { %v769_v5 = vpop.f32.mrb[4].mxu0  ;;  %v812_v45 = vpop.f32.mrb[4].mxu1 }
 0x11e   : > { %v867_v44 = vmul.f32 %v842_v37, %v769_v5  ;;  %v771_v46 = vpop.f32.mrb[5].mxu0  ;;  %v869_v48 = vmul.f32 %v850_v38, %v812_v45  ;;  %v814_v50 = vpop.f32.mrb[5].mxu1 }
 0x11f   : > { %v868_v49 = vmul.f32 %v846_v39, %v771_v46  ;;  %v773_v51 = vpop.f32.mrb[6].mxu0  ;;  %v870_v53 = vmul.f32 %v854_v41, %v814_v50  ;;  %v816_v54 = vpop.f32.mrb[6].mxu1 }
 0x120   : > { %v925_v52 = vadd.f32 %v900_v40, %v867_v44  ;;  %v875_v7 = vmul.f32 %v842_v37, %v773_v51  ;;  %v775_v55 = vpop.f32.mrb[7].mxu0  ;;  %v927_v56 = vadd.f32 %v908_v42, %v869_v48  ;;  %v877_v58 = vmul.f32 %v850_v38, %v816_v54  ;;  %v818_v60 = vpop.f32.mrb[7].mxu1 }
 0x121   : > { %v926_v57 = vadd.f32 %v904_v43, %v868_v49  ;;  %v876_v59 = vmul.f32 %v846_v39, %v775_v55  ;;  %v928_v61 = vadd.f32 %v912_v47, %v870_v53  ;;  %v878_v63 = vmul.f32 %v854_v41, %v818_v60 }
 0x122   : > { %v933_v62 = vadd.f32 %v900_v40, %v875_v7  ;;  %v935_v0 = vadd.f32 %v908_v42, %v877_v58  ;;  %v941_v12 = vmax.f32 %v925_v52, 0.0  ;;  %v943_v13 = vmax.f32 %v927_v56, 0.0 }
 0x123   : > { %v934_v1 = vadd.f32 %v904_v43, %v876_v59  ;;  %v936_v3 = vadd.f32 %v912_v47, %v878_v63  ;;  %v942_v14 = vmax.f32 %v926_v57, 0.0  ;;  %v944_v17 = vmax.f32 %v928_v61, 0.0 }
 0x124   : > { %v949_v2 = vmax.f32 %v933_v62, 0.0  ;;  %v951_v15 = vmax.f32 %v935_v0, 0.0  ;;  %v1058_v57 = vrot.slane %v1050_v36, %v4381_v27  ;;  %v3567_v0 = vld [vmem:[%s5035_s4 + $0x200] ss:$16 sps:$4 sm:$0xff]  }
 0x125   : > { %v950_v16 = vmax.f32 %v934_v1, 0.0  ;;  %v952_v19 = vmax.f32 %v936_v3, 0.0  ;;  %v3573_v36 = vld [vmem:[%s5035_s4 + $0x220] ss:$16 sps:$4 sm:$0xff]   ;;  %v3576_v1 = vld [vmem:[%s5035_s4 + $0x228] ss:$16 sps:$4 sm:$0xff]  }
 0x126   : > { %v982_v18 = vmax.f32 %v941_v12, %v949_v2  ;;  %v996_v20 = vmax.f32 %v943_v13, %v951_v15  ;;  %v3581_v12 = vld [vmem:[%s5035_s4 + $0x244] ss:$16 sps:$4 sm:$0xff]   ;;  %v3584_v2 = vld [vmem:[%s5035_s4 + $0x24c] ss:$16 sps:$4 sm:$0xff]   ;;  %v3579_v3 = vld [vmem:[%s5035_s4 + $0x240] ss:$16 sps:$4 sm:$0xff]  }
 0x127   : > { %v989_v21 = vmax.f32 %v942_v14, %v950_v16  ;;  %v1003_v23 = vmax.f32 %v944_v17, %v952_v19  ;;  %v3582_v13 = vld [vmem:[%s5035_s4 + $0x248] ss:$16 sps:$4 sm:$0xff]   ;;  %v3587_v14 = vld [vmem:[%s5035_s4 + $0x264] ss:$16 sps:$4 sm:$0xff]   ;;  %v3590_v15 = vld [vmem:[%s5035_s4 + $0x26c] ss:$16 sps:$4 sm:$0xff]  }
 0x128   : > { %v983_v22 = vrot.slane %v982_v18, 4  ;;  %v997_v24 = vrot.slane %v996_v20, 4  ;;  %v3585_v16 = vld [vmem:[%s5035_s4 + $0x260] ss:$16 sps:$4 sm:$0xff]   ;;  %v3588_v17 = vld [vmem:[%s5035_s4 + $0x268] ss:$16 sps:$4 sm:$0xff]  }
 0x129   : > { %v990_v25 = vrot.slane %v989_v21, 4  ;;  %v1004_v28 = vrot.slane %v1003_v23, 4  ;;  %v3596_v19 = vld [vmem:[%s5035_s4 + $0x28c] ss:$16 sps:$4 sm:$0xff]  }
 0x12a   : > { %v984_v26 = vmax.f32 %v982_v18, %v983_v22  ;;  %v998_v29 = vmax.f32 %v996_v20, %v997_v24  ;;  %v3593_v18 = vld [vmem:[%s5035_s4 + $0x284] ss:$16 sps:$4 sm:$0xff]   ;;  %v3591_v20 = vld [vmem:[%s5035_s4 + $0x280] ss:$16 sps:$4 sm:$0xff]  }
 0x12b   : > { %v991_v30 = vmax.f32 %v989_v21, %v990_v25  ;;  %v1005_v38 = vmax.f32 %v1003_v23, %v1004_v28  ;;  %v3594_v21 = vld [vmem:[%s5035_s4 + $0x288] ss:$16 sps:$4 sm:$0xff]   ;;  %v3599_v22 = vld [vmem:[%s5035_s4 + $0x2a4] ss:$16 sps:$4 sm:$0xff]   ;;  %v3602_v23 = vld [vmem:[%s5035_s4 + $0x2ac] ss:$16 sps:$4 sm:$0xff]  }
 0x12c   : > { %v985_v37 = vrot.slane %v984_v26, 2  ;;  %v999_v39 = vrot.slane %v998_v29, 2  ;;  %v3597_v24 = vld [vmem:[%s5035_s4 + $0x2a0] ss:$16 sps:$4 sm:$0xff]   ;;  %v3600_v25 = vld [vmem:[%s5035_s4 + $0x2a8] ss:$16 sps:$4 sm:$0xff]  }
 0x12d   : > { %v992_v40 = vrot.slane %v991_v30, 2  ;;  %v1006_v5 = vrot.slane %v1005_v38, 2  ;;  %v3608_v28 = vld [vmem:[%s5035_s4 + $0x2cc] ss:$16 sps:$4 sm:$0xff]  }
 0x12e   : > { %v986_v41 = vmax.f32 %v984_v26, %v985_v37  ;;  %v1000_v42 = vmax.f32 %v998_v29, %v999_v39  ;;  %v3605_v26 = vld [vmem:[%s5035_s4 + $0x2c4] ss:$16 sps:$4 sm:$0xff]   ;;  %v3603_v29 = vld [vmem:[%s5035_s4 + $0x2c0] ss:$16 sps:$4 sm:$0xff]  }
 0x12f   : > { %v993_v43 = vmax.f32 %v991_v30, %v992_v40  ;;  %v1007_v45 = vmax.f32 %v1005_v38, %v1006_v5  ;;  %v3606_v30 = vld [vmem:[%s5035_s4 + $0x2c8] ss:$16 sps:$4 sm:$0xff]   ;;  %v3611_v37 = vld [vmem:[%s5035_s4 + $0x2e4] ss:$16 sps:$4 sm:$0xff]   ;;  %v3614_v38 = vld [vmem:[%s5035_s4 + $0x2ec] ss:$16 sps:$4 sm:$0xff]  }
 0x130   : > { %v987_v44 = vrot.slane %v986_v41, 1  ;;  %v1001_v46 = vrot.slane %v1000_v42, 1  ;;  %v3609_v39 = vld [vmem:[%s5035_s4 + $0x2e0] ss:$16 sps:$4 sm:$0xff]   ;;  %v3612_v40 = vld [vmem:[%s5035_s4 + $0x2e8] ss:$16 sps:$4 sm:$0xff]  }
 0x131   : > { %v994_v47 = vrot.slane %v993_v43, 1  ;;  %v1008_v49 = vrot.slane %v1007_v45, 1  ;;  %v3620_v5 = vld [vmem:[%s5035_s4 + $0x30c] ss:$16 sps:$4 sm:$0xff]  }
 0x132   : > { %v988_v48 = vmax.f32 %v986_v41, %v987_v44  ;;  %v1002_v50 = vmax.f32 %v1000_v42, %v1001_v46  ;;  %v3617_v41 = vld [vmem:[%s5035_s4 + $0x304] ss:$16 sps:$4 sm:$0xff]   ;;  %v3615_v42 = vld [vmem:[%s5035_s4 + $0x300] ss:$16 sps:$4 sm:$0xff]  }
 0x133   : > { %v995_v51 = vmax.f32 %v993_v43, %v994_v47  ;;  %v1009_v52 = vmax.f32 %v1007_v45, %v1008_v49  ;;  %v3618_v43 = vld [vmem:[%s5035_s4 + $0x308] ss:$16 sps:$4 sm:$0xff]   ;;  %v3623_v44 = vld [vmem:[%s5035_s4 + $0x324] ss:$16 sps:$4 sm:$0xff]   ;;  %v3626_v45 = vld [vmem:[%s5035_s4 + $0x32c] ss:$16 sps:$4 sm:$0xff]  }
 0x134   : > { %v3621_v46 = vld [vmem:[%s5035_s4 + $0x320] ss:$16 sps:$4 sm:$0xff]   ;;  %v3624_v47 = vld [vmem:[%s5035_s4 + $0x328] ss:$16 sps:$4 sm:$0xff]   ;;  %v3632_v49 = vld [vmem:[%s5035_s4 + $0x34c] ss:$16 sps:$4 sm:$0xff]  }
 0x135   : > { %v1020_v53 = vcombine.low %v988_v48, %v995_v51  ;;  %v1021_v7 = vcombine.low %v1002_v50, %v1009_v52  ;;  %v3629_v48 = vld [vmem:[%s5035_s4 + $0x344] ss:$16 sps:$4 sm:$0xff]   ;;  %v3627_v50 = vld [vmem:[%s5035_s4 + $0x340] ss:$16 sps:$4 sm:$0xff]   ;;  %v3630_v51 = vld [vmem:[%s5035_s4 + $0x348] ss:$16 sps:$4 sm:$0xff]  }
 0x136   : > { %v3635_v52 = vld [vmem:[%s5035_s4 + $0x364] ss:$16 sps:$4 sm:$0xff]  }
 0x137   : > { %v1042_v54 = vrot.slane %v1020_v53, %v4381_v27  ;;  %v1049_v55 = vrot.slane %v1021_v7, %v4381_v27  ;;  %v3638_v53 = vld [vmem:[%s5035_s4 + $0x36c] ss:$16 sps:$4 sm:$0xff]   ;;  %v3633_v7 = vld [vmem:[%s5035_s4 + $0x360] ss:$16 sps:$4 sm:$0xff]  }
 0x139   : > { %v1051_v56 = vcombine.low %v1042_v54, %v1049_v55  ;;  %v3636_v54 = vld [vmem:[%s5035_s4 + $0x368] ss:$16 sps:$4 sm:$0xff]   ;;  %v3641_v55 = vld [vmem:[%s5035_s4 + $0x384] ss:$16 sps:$4 sm:$0xff]  }
 0x13b   : > { %v1065_v58 = vrot.slane %v1051_v56, %v4381_v27  ;;  %v3644_v56 = vld [vmem:[%s5035_s4 + $0x38c] ss:$16 sps:$4 sm:$0xff]  }
 0x13d   : > { %v4426_v59 = vcombine.low %v1058_v57, %v1065_v58  ;;  %v3639_v57 = vld [vmem:[%s5035_s4 + $0x380] ss:$16 sps:$4 sm:$0xff]   ;;  %v3642_v58 = vld [vmem:[%s5035_s4 + $0x388] ss:$16 sps:$4 sm:$0xff]  }
 0x13f   : > { %v1082_v60 = vrot.slane %v4426_v59, %v4354_v10  ;;  %v1078_v61 = vrot.slane %v4426_v59, %v4343_v6  ;;  %v1090_v62 = vrot.slane %v4426_v59, %v4357_v11  ;;  %v3575_v10 = vld [vmem:[%s5035_s4 + $0x224] ss:$16 sps:$4 sm:$0xff]   ;;  %v3578_v6 = vld [vmem:[%s5035_s4 + $0x22c] ss:$16 sps:$4 sm:$0xff]  }
 0x141   : > { %v1116_v63 = vpack.c.bf16 %v1082_v60, %v1082_v60  ;;  %v1115_v8 = vpack.c.bf16 %v1078_v61, %v1078_v61  ;;  %v1118_v11 = vpack.c.bf16 %v1090_v62, %v1090_v62  ;;  %v3647_v60 = vld [vmem:[%s5035_s4 + $0x3a4] ss:$16 sps:$4 sm:$0xff]   ;;  %v3650_v61 = vld [vmem:[%s5035_s4 + $0x3ac] ss:$16 sps:$4 sm:$0xff]   ;;  %v3645_v62 = vld [vmem:[%s5035_s4 + $0x3a0] ss:$16 sps:$4 sm:$0xff]  }
 0x143   : > { %2691 = vmatprep.mubr.bf16.mxu0 %v1116_v63  ;;  %2855 = vmatprep.mubr.bf16.mxu1 %v1116_v63  ;;  %v3648_v63 = vld [vmem:[%s5035_s4 + $0x3a8] ss:$16 sps:$4 sm:$0xff]  }
 0x144   : > { %2692 = vmatmul.mubr.bf16.vlgmr.msra.gmra.mrb[8].mxu0 %v1115_v8  ;;  %2856 = vmatmul.mubr.bf16.vlgmr.msra.gmra.mrb[8].mxu1 %v1115_v8  ;;  %v3651_v8 = vld [vmem:[%s5035_s4 + $0x3c0] ss:$16 sps:$4 sm:$0xff]  }
 0x145   : > { %2701 = vmatpush1.bf16.msra.mxu0 %v3567_v0  ;;  %2865 = vmatpush1.bf16.msra.mxu1 %v3570_v32  ;;  %v3653_v0 = vld [vmem:[%s5035_s4 + $0x3c4] ss:$16 sps:$4 sm:$0xff]   ;;  %v3656_v32 = vld [vmem:[%s5035_s4 + $0x3cc] ss:$16 sps:$4 sm:$0xff]  }
 0x146   : > { %2732 = vmatprep.mubr.bf16.mxu0 %v1118_v11  ;;  %2896 = vmatprep.mubr.bf16.mxu1 %v1118_v11  ;;  %v3662_v11 = vld [vmem:[%s5035_s4 + $0x3ec] ss:$16 sps:$4 sm:$0xff]  }
 0x147   : > { %2702 = vmatprep.subr.bf16.mxu0 %v3575_v10  ;;  %2866 = vmatprep.subr.bf16.mxu1 %v3578_v6  ;;  %v3654_v10 = vld [vmem:[%s5035_s4 + $0x3c8] ss:$16 sps:$4 sm:$0xff]   ;;  %v3659_v6 = vld [vmem:[%s5035_s4 + $0x3e4] ss:$16 sps:$4 sm:$0xff]  }
 0x149   : > { %2703 = vmatpush1.bf16.msra.mxu0 %v3573_v36  ;;  %2867 = vmatpush1.bf16.msra.mxu1 %v3576_v1  ;;  %v3657_v36 = vld [vmem:[%s5035_s4 + $0x3e0] ss:$16 sps:$4 sm:$0xff]   ;;  %v3660_v1 = vld [vmem:[%s5035_s4 + $0x3e8] ss:$16 sps:$4 sm:$0xff]  }
 0x14a   : > { %2704 = vmatprep.subr.bf16.mxu0 %v3581_v12  ;;  %2868 = vmatprep.subr.bf16.mxu1 %v3584_v2  ;;  %v1086_v12 = vrot.slane %v4426_v59, %v4351_v9  ;;  %v3665_v2 = vld [vmem:[%s5035_s4 + $0x404] ss:$16 sps:$4 sm:$0xff]   ;;  %v3666_v9 = vld [vmem:[%s5035_s4 + $0x408] ss:$16 sps:$4 sm:$0xff]  }
 0x14d   : > { %2705 = vmatpush1.bf16.msra.mxu0 %v3579_v3  ;;  %2869 = vmatpush1.bf16.msra.mxu1 %v3582_v13  ;;  %v3668_v3 = vld [vmem:[%s5035_s4 + $0x40c] ss:$16 sps:$4 sm:$0xff]   ;;  %v1098_v13 = vrot.slane %v4426_v59, %v4393_v34 }
 0x14e   : > { %2706 = vmatprep.subr.bf16.mxu0 %v3587_v14  ;;  %2870 = vmatprep.subr.bf16.mxu1 %v3590_v15  ;;  %v3663_v14 = vld [vmem:[%s5035_s4 + $0x400] ss:$16 sps:$4 sm:$0xff]   ;;  %v1117_v15 = vpack.c.bf16 %v1086_v12, %v1086_v12  ;;  %v3674_v34 = vld [vmem:[%s5035_s4 + $0x42c] ss:$16 sps:$4 sm:$0xff]  }
 0x14f   : > { %v3741_v12 = vld [vmem:[%s5035_s4 + $0x5a0] ss:$16 sps:$4 sm:$0xff]  }
 0x151   : > { %2707 = vmatpush1.bf16.msra.mxu0 %v3585_v16  ;;  %2871 = vmatpush1.bf16.msra.mxu1 %v3588_v17  ;;  %v1120_v16 = vpack.c.bf16 %v1098_v13, %v1098_v13  ;;  %v3671_v17 = vld [vmem:[%s5035_s4 + $0x424] ss:$16 sps:$4 sm:$0xff]   ;;  %v3752_v13 = vld [vmem:[%s5035_s4 + $0x5cc] ss:$16 sps:$4 sm:$0xff]  }
 0x152   : > { %2708 = vmatprep.subr.bf16.mxu0 %v3593_v18  ;;  %2872 = vmatprep.subr.bf16.mxu1 %v3596_v19  ;;  %v3669_v18 = vld [vmem:[%s5035_s4 + $0x420] ss:$16 sps:$4 sm:$0xff]   ;;  %v3672_v19 = vld [vmem:[%s5035_s4 + $0x428] ss:$16 sps:$4 sm:$0xff]  }
 0x155   : > { %2709 = vmatpush1.bf16.msra.mxu0 %v3591_v20  ;;  %2873 = vmatpush1.bf16.msra.mxu1 %v3594_v21  ;;  %v3677_v20 = vld [vmem:[%s5035_s4 + $0x444] ss:$16 sps:$4 sm:$0xff]   ;;  %v3680_v21 = vld [vmem:[%s5035_s4 + $0x44c] ss:$16 sps:$4 sm:$0xff]  }
 0x156   : > { %2710 = vmatprep.subr.bf16.mxu0 %v3599_v22  ;;  %2874 = vmatprep.subr.bf16.mxu1 %v3602_v23  ;;  %v3675_v22 = vld [vmem:[%s5035_s4 + $0x440] ss:$16 sps:$4 sm:$0xff]   ;;  %v3678_v23 = vld [vmem:[%s5035_s4 + $0x448] ss:$16 sps:$4 sm:$0xff]  }
 0x159   : > { %2711 = vmatpush1.bf16.msra.mxu0 %v3597_v24  ;;  %2875 = vmatpush1.bf16.msra.mxu1 %v3600_v25  ;;  %v3683_v24 = vld [vmem:[%s5035_s4 + $0x464] ss:$16 sps:$4 sm:$0xff]   ;;  %v3686_v25 = vld [vmem:[%s5035_s4 + $0x46c] ss:$16 sps:$4 sm:$0xff]  }
 0x15a   : > { %2712 = vmatprep.subr.bf16.mxu0 %v3605_v26  ;;  %2876 = vmatprep.subr.bf16.mxu1 %v3608_v28  ;;  %v3681_v26 = vld [vmem:[%s5035_s4 + $0x460] ss:$16 sps:$4 sm:$0xff]   ;;  %v3684_v28 = vld [vmem:[%s5035_s4 + $0x468] ss:$16 sps:$4 sm:$0xff]  }
 0x15d   : > { %2713 = vmatpush1.bf16.msra.mxu0 %v3603_v29  ;;  %2877 = vmatpush1.bf16.msra.mxu1 %v3606_v30  ;;  %v3689_v29 = vld [vmem:[%s5035_s4 + $0x484] ss:$16 sps:$4 sm:$0xff]   ;;  %v3692_v30 = vld [vmem:[%s5035_s4 + $0x48c] ss:$16 sps:$4 sm:$0xff]  }
 0x15e   : > { %2714 = vmatprep.subr.bf16.mxu0 %v3611_v37  ;;  %2878 = vmatprep.subr.bf16.mxu1 %v3614_v38  ;;  %v3687_v37 = vld [vmem:[%s5035_s4 + $0x480] ss:$16 sps:$4 sm:$0xff]   ;;  %v3690_v38 = vld [vmem:[%s5035_s4 + $0x488] ss:$16 sps:$4 sm:$0xff]  }
 0x161   : > { %2715 = vmatpush1.bf16.msra.mxu0 %v3609_v39  ;;  %2879 = vmatpush1.bf16.msra.mxu1 %v3612_v40  ;;  %v3695_v39 = vld [vmem:[%s5035_s4 + $0x4a4] ss:$16 sps:$4 sm:$0xff]   ;;  %v3698_v40 = vld [vmem:[%s5035_s4 + $0x4ac] ss:$16 sps:$4 sm:$0xff]  }
 0x162   : > { %2716 = vmatprep.subr.bf16.mxu0 %v3617_v41  ;;  %2880 = vmatprep.subr.bf16.mxu1 %v3620_v5  ;;  %v3693_v41 = vld [vmem:[%s5035_s4 + $0x4a0] ss:$16 sps:$4 sm:$0xff]   ;;  %v3696_v5 = vld [vmem:[%s5035_s4 + $0x4a8] ss:$16 sps:$4 sm:$0xff]  }
 0x165   : > { %2717 = vmatpush1.bf16.msra.mxu0 %v3615_v42  ;;  %2881 = vmatpush1.bf16.msra.mxu1 %v3618_v43  ;;  %v3701_v42 = vld [vmem:[%s5035_s4 + $0x4c4] ss:$16 sps:$4 sm:$0xff]   ;;  %v3704_v43 = vld [vmem:[%s5035_s4 + $0x4cc] ss:$16 sps:$4 sm:$0xff]  }
 0x166   : > { %2718 = vmatprep.subr.bf16.mxu0 %v3623_v44  ;;  %2882 = vmatprep.subr.bf16.mxu1 %v3626_v45  ;;  %v3699_v44 = vld [vmem:[%s5035_s4 + $0x4c0] ss:$16 sps:$4 sm:$0xff]   ;;  %v3702_v45 = vld [vmem:[%s5035_s4 + $0x4c8] ss:$16 sps:$4 sm:$0xff]  }
 0x169   : > { %2719 = vmatpush1.bf16.msra.mxu0 %v3621_v46  ;;  %2883 = vmatpush1.bf16.msra.mxu1 %v3624_v47  ;;  %v3707_v46 = vld [vmem:[%s5035_s4 + $0x4e4] ss:$16 sps:$4 sm:$0xff]   ;;  %v3710_v47 = vld [vmem:[%s5035_s4 + $0x4ec] ss:$16 sps:$4 sm:$0xff]  }
 0x16a   : > { %2720 = vmatprep.subr.bf16.mxu0 %v3629_v48  ;;  %2884 = vmatprep.subr.bf16.mxu1 %v3632_v49  ;;  %v3705_v48 = vld [vmem:[%s5035_s4 + $0x4e0] ss:$16 sps:$4 sm:$0xff]   ;;  %v3708_v49 = vld [vmem:[%s5035_s4 + $0x4e8] ss:$16 sps:$4 sm:$0xff]  }
 0x16d   : > { %2721 = vmatpush1.bf16.msra.mxu0 %v3627_v50  ;;  %2885 = vmatpush1.bf16.msra.mxu1 %v3630_v51  ;;  %v3713_v50 = vld [vmem:[%s5035_s4 + $0x504] ss:$16 sps:$4 sm:$0xff]   ;;  %v3716_v51 = vld [vmem:[%s5035_s4 + $0x50c] ss:$16 sps:$4 sm:$0xff]  }
 0x16e   : > { %2722 = vmatprep.subr.bf16.mxu0 %v3635_v52  ;;  %2886 = vmatprep.subr.bf16.mxu1 %v3638_v53  ;;  %v3711_v52 = vld [vmem:[%s5035_s4 + $0x500] ss:$16 sps:$4 sm:$0xff]   ;;  %v3714_v53 = vld [vmem:[%s5035_s4 + $0x508] ss:$16 sps:$4 sm:$0xff]  }
 0x171   : > { %2723 = vmatpush1.bf16.msra.mxu0 %v3633_v7  ;;  %2887 = vmatpush1.bf16.msra.mxu1 %v3636_v54  ;;  %v3719_v7 = vld [vmem:[%s5035_s4 + $0x524] ss:$16 sps:$4 sm:$0xff]   ;;  %v3722_v54 = vld [vmem:[%s5035_s4 + $0x52c] ss:$16 sps:$4 sm:$0xff]  }
 0x172   : > { %2724 = vmatprep.subr.bf16.mxu0 %v3641_v55  ;;  %2888 = vmatprep.subr.bf16.mxu1 %v3644_v56  ;;  %v3717_v55 = vld [vmem:[%s5035_s4 + $0x520] ss:$16 sps:$4 sm:$0xff]   ;;  %v3720_v56 = vld [vmem:[%s5035_s4 + $0x528] ss:$16 sps:$4 sm:$0xff]  }
 0x175   : > { %2725 = vmatpush1.bf16.msra.mxu0 %v3639_v57  ;;  %2889 = vmatpush1.bf16.msra.mxu1 %v3642_v58  ;;  %v3725_v57 = vld [vmem:[%s5035_s4 + $0x544] ss:$16 sps:$4 sm:$0xff]   ;;  %v3728_v58 = vld [vmem:[%s5035_s4 + $0x54c] ss:$16 sps:$4 sm:$0xff]  }
 0x176   : > { %2726 = vmatprep.subr.bf16.mxu0 %v3647_v60  ;;  %2890 = vmatprep.subr.bf16.mxu1 %v3650_v61  ;;  %v3723_v60 = vld [vmem:[%s5035_s4 + $0x540] ss:$16 sps:$4 sm:$0xff]   ;;  %v3726_v61 = vld [vmem:[%s5035_s4 + $0x548] ss:$16 sps:$4 sm:$0xff]  }
 0x179   : > { %2727 = vmatpush1.bf16.msra.mxu0 %v3645_v62  ;;  %2891 = vmatpush1.bf16.msra.mxu1 %v3648_v63  ;;  %v3731_v62 = vld [vmem:[%s5035_s4 + $0x564] ss:$16 sps:$4 sm:$0xff]   ;;  %v3734_v63 = vld [vmem:[%s5035_s4 + $0x56c] ss:$16 sps:$4 sm:$0xff]  }
 0x17a   : > { %2728 = vmatprep.subr.bf16.mxu0 %v3653_v0  ;;  %2892 = vmatprep.subr.bf16.mxu1 %v3656_v32  ;;  %v3729_v0 = vld [vmem:[%s5035_s4 + $0x560] ss:$16 sps:$4 sm:$0xff]   ;;  %v3732_v32 = vld [vmem:[%s5035_s4 + $0x568] ss:$16 sps:$4 sm:$0xff]  }
 0x17d   : > { %2729 = vmatpush1.bf16.msra.mxu0 %v3651_v8  ;;  %2893 = vmatpush1.bf16.msra.mxu1 %v3654_v10  ;;  %v3737_v8 = vld [vmem:[%s5035_s4 + $0x584] ss:$16 sps:$4 sm:$0xff]   ;;  %v3740_v10 = vld [vmem:[%s5035_s4 + $0x58c] ss:$16 sps:$4 sm:$0xff]  }
 0x17e   : > { %2730 = vmatprep.subr.bf16.mxu0 %v3659_v6  ;;  %2894 = vmatprep.subr.bf16.mxu1 %v3662_v11  ;;  %v3735_v6 = vld [vmem:[%s5035_s4 + $0x580] ss:$16 sps:$4 sm:$0xff]   ;;  %v3738_v11 = vld [vmem:[%s5035_s4 + $0x588] ss:$16 sps:$4 sm:$0xff]  }
 0x181   : > { %2731 = vmatpush1.bf16.msra.mxu0 %v3657_v36  ;;  %2895 = vmatpush1.bf16.msra.mxu1 %v3660_v1  ;;  %v3743_v36 = vld [vmem:[%s5035_s4 + $0x5a4] ss:$16 sps:$4 sm:$0xff]   ;;  %v3746_v1 = vld [vmem:[%s5035_s4 + $0x5ac] ss:$16 sps:$4 sm:$0xff]  }
 0x182   : > { %2741 = vmatprep.subr.bf16.mxu0 %v3665_v2  ;;  %2905 = vmatprep.subr.bf16.mxu1 %v3668_v3  ;;  %v3744_v2 = vld [vmem:[%s5035_s4 + $0x5a8] ss:$16 sps:$4 sm:$0xff]   ;;  %v3749_v3 = vld [vmem:[%s5035_s4 + $0x5c4] ss:$16 sps:$4 sm:$0xff]  }
 0x184   : > { %2733 = vmatmul.mubr.bf16.vlgmr.msra.gmra.mrb[8].mxu0 %v1117_v15  ;;  %2897 = vmatmul.mubr.bf16.vlgmr.msra.gmra.mrb[8].mxu1 %v1117_v15  ;;  %v3750_v15 = vld [vmem:[%s5035_s4 + $0x5c8] ss:$16 sps:$4 sm:$0xff]  }
 0x185   : > { %2742 = vmatpush1.bf16.msra.mxu0 %v3663_v14  ;;  %2773 = vmatprep.mubr.bf16.mxu0 %v1120_v16  ;;  %v3747_v14 = vld [vmem:[%s5035_s4 + $0x5c0] ss:$16 sps:$4 sm:$0xff]  }
 0x186   : > { %2906 = vmatpush1.bf16.msra.mxu1 %v3666_v9  ;;  %2937 = vmatprep.mubr.bf16.mxu1 %v1120_v16  ;;  %v3755_v9 = vld [vmem:[%s5035_s4 + $0x5e4] ss:$16 sps:$4 sm:$0xff]   ;;  %v3758_v16 = vld [vmem:[%s5035_s4 + $0x5ec] ss:$16 sps:$4 sm:$0xff]  }
 0x187   : > { %2743 = vmatprep.subr.bf16.mxu0 %v3671_v17  ;;  %2907 = vmatprep.subr.bf16.mxu1 %v3674_v34  ;;  %v3753_v17 = vld [vmem:[%s5035_s4 + $0x5e0] ss:$16 sps:$4 sm:$0xff]   ;;  %v3756_v34 = vld [vmem:[%s5035_s4 + $0x5e8] ss:$16 sps:$4 sm:$0xff]  }
 0x189   : > { %2744 = vmatpush1.bf16.msra.mxu0 %v3669_v18  ;;  %v1094_v18 = vrot.slane %v4426_v59, %v4384_v31  ;;  %v3762_v31 = vld [vmem:[%s5035_s4 + $0x608] ss:$16 sps:$4 sm:$0xff]  }
 0x18a   : > { %2908 = vmatpush1.bf16.msra.mxu1 %v3672_v19  ;;  %2745 = vmatprep.subr.bf16.mxu0 %v3677_v20  ;;  %v3761_v19 = vld [vmem:[%s5035_s4 + $0x604] ss:$16 sps:$4 sm:$0xff]   ;;  %v3764_v20 = vld [vmem:[%s5035_s4 + $0x60c] ss:$16 sps:$4 sm:$0xff]  }
 0x18b   : > { %2909 = vmatprep.subr.bf16.mxu1 %v3680_v21  ;;  %v1106_v21 = vrot.slane %v4426_v59, %v4399_v35  ;;  %v3770_v35 = vld [vmem:[%s5035_s4 + $0x62c] ss:$16 sps:$4 sm:$0xff]  }
 0x18d   : > { %2746 = vmatpush1.bf16.msra.mxu0 %v3675_v22  ;;  %v3759_v22 = vld [vmem:[%s5035_s4 + $0x600] ss:$16 sps:$4 sm:$0xff]  }
 0x18e   : > { %2910 = vmatpush1.bf16.msra.mxu1 %v3678_v23  ;;  %2747 = vmatprep.subr.bf16.mxu0 %v3683_v24  ;;  %v1119_v23 = vpack.c.bf16 %v1094_v18, %v1094_v18  ;;  %v3767_v24 = vld [vmem:[%s5035_s4 + $0x624] ss:$16 sps:$4 sm:$0xff]  }
 0x18f   : > { %2911 = vmatprep.subr.bf16.mxu1 %v3686_v25  ;;  %v1122_v25 = vpack.c.bf16 %v1106_v21, %v1106_v21  ;;  %v3845_v18 = vld [vmem:[%s5035_s4 + $0x7c4] ss:$16 sps:$4 sm:$0xff]   ;;  %v3846_v21 = vld [vmem:[%s5035_s4 + $0x7c8] ss:$16 sps:$4 sm:$0xff]  }
 0x191   : > { %2748 = vmatpush1.bf16.msra.mxu0 %v3681_v26  ;;  %v3765_v26 = vld [vmem:[%s5035_s4 + $0x620] ss:$16 sps:$4 sm:$0xff]  }
 0x192   : > { %2912 = vmatpush1.bf16.msra.mxu1 %v3684_v28  ;;  %2749 = vmatprep.subr.bf16.mxu0 %v3689_v29  ;;  %v3768_v28 = vld [vmem:[%s5035_s4 + $0x628] ss:$16 sps:$4 sm:$0xff]   ;;  %v3773_v29 = vld [vmem:[%s5035_s4 + $0x644] ss:$16 sps:$4 sm:$0xff]  }
 0x193   : > { %2913 = vmatprep.subr.bf16.mxu1 %v3692_v30  ;;  %v3776_v30 = vld [vmem:[%s5035_s4 + $0x64c] ss:$16 sps:$4 sm:$0xff]  }
 0x195   : > { %2750 = vmatpush1.bf16.msra.mxu0 %v3687_v37  ;;  %v3771_v37 = vld [vmem:[%s5035_s4 + $0x640] ss:$16 sps:$4 sm:$0xff]  }
 0x196   : > { %2914 = vmatpush1.bf16.msra.mxu1 %v3690_v38  ;;  %2751 = vmatprep.subr.bf16.mxu0 %v3695_v39  ;;  %v3774_v38 = vld [vmem:[%s5035_s4 + $0x648] ss:$16 sps:$4 sm:$0xff]   ;;  %v3779_v39 = vld [vmem:[%s5035_s4 + $0x664] ss:$16 sps:$4 sm:$0xff]  }
 0x197   : > { %2915 = vmatprep.subr.bf16.mxu1 %v3698_v40  ;;  %v3782_v40 = vld [vmem:[%s5035_s4 + $0x66c] ss:$16 sps:$4 sm:$0xff]  }
 0x199   : > { %2752 = vmatpush1.bf16.msra.mxu0 %v3693_v41  ;;  %v3777_v41 = vld [vmem:[%s5035_s4 + $0x660] ss:$16 sps:$4 sm:$0xff]  }
 0x19a   : > { %2916 = vmatpush1.bf16.msra.mxu1 %v3696_v5  ;;  %2753 = vmatprep.subr.bf16.mxu0 %v3701_v42  ;;  %v3780_v5 = vld [vmem:[%s5035_s4 + $0x668] ss:$16 sps:$4 sm:$0xff]   ;;  %v3785_v42 = vld [vmem:[%s5035_s4 + $0x684] ss:$16 sps:$4 sm:$0xff]  }
 0x19b   : > { %2917 = vmatprep.subr.bf16.mxu1 %v3704_v43  ;;  %v3788_v43 = vld [vmem:[%s5035_s4 + $0x68c] ss:$16 sps:$4 sm:$0xff]  }
 0x19d   : > { %2754 = vmatpush1.bf16.msra.mxu0 %v3699_v44  ;;  %v3783_v44 = vld [vmem:[%s5035_s4 + $0x680] ss:$16 sps:$4 sm:$0xff]  }
 0x19e   : > { %2918 = vmatpush1.bf16.msra.mxu1 %v3702_v45  ;;  %2755 = vmatprep.subr.bf16.mxu0 %v3707_v46  ;;  %v3786_v45 = vld [vmem:[%s5035_s4 + $0x688] ss:$16 sps:$4 sm:$0xff]   ;;  %v3791_v46 = vld [vmem:[%s5035_s4 + $0x6a4] ss:$16 sps:$4 sm:$0xff]  }
 0x19f   : > { %2919 = vmatprep.subr.bf16.mxu1 %v3710_v47  ;;  %v3794_v47 = vld [vmem:[%s5035_s4 + $0x6ac] ss:$16 sps:$4 sm:$0xff]  }
 0x1a1   : > { %2756 = vmatpush1.bf16.msra.mxu0 %v3705_v48  ;;  %v3789_v48 = vld [vmem:[%s5035_s4 + $0x6a0] ss:$16 sps:$4 sm:$0xff]  }
 0x1a2   : > { %2920 = vmatpush1.bf16.msra.mxu1 %v3708_v49  ;;  %2757 = vmatprep.subr.bf16.mxu0 %v3713_v50  ;;  %v3792_v49 = vld [vmem:[%s5035_s4 + $0x6a8] ss:$16 sps:$4 sm:$0xff]   ;;  %v3797_v50 = vld [vmem:[%s5035_s4 + $0x6c4] ss:$16 sps:$4 sm:$0xff]  }
 0x1a3   : > { %2921 = vmatprep.subr.bf16.mxu1 %v3716_v51  ;;  %v3800_v51 = vld [vmem:[%s5035_s4 + $0x6cc] ss:$16 sps:$4 sm:$0xff]  }
 0x1a5   : > { %2758 = vmatpush1.bf16.msra.mxu0 %v3711_v52  ;;  %v3795_v52 = vld [vmem:[%s5035_s4 + $0x6c0] ss:$16 sps:$4 sm:$0xff]  }
 0x1a6   : > { %2922 = vmatpush1.bf16.msra.mxu1 %v3714_v53  ;;  %2759 = vmatprep.subr.bf16.mxu0 %v3719_v7  ;;  %v3798_v53 = vld [vmem:[%s5035_s4 + $0x6c8] ss:$16 sps:$4 sm:$0xff]   ;;  %v3803_v7 = vld [vmem:[%s5035_s4 + $0x6e4] ss:$16 sps:$4 sm:$0xff]  }
 0x1a7   : > { %2923 = vmatprep.subr.bf16.mxu1 %v3722_v54  ;;  %v3806_v54 = vld [vmem:[%s5035_s4 + $0x6ec] ss:$16 sps:$4 sm:$0xff]  }
 0x1a9   : > { %2760 = vmatpush1.bf16.msra.mxu0 %v3717_v55  ;;  %v3801_v55 = vld [vmem:[%s5035_s4 + $0x6e0] ss:$16 sps:$4 sm:$0xff]  }
 0x1aa   : > { %2924 = vmatpush1.bf16.msra.mxu1 %v3720_v56  ;;  %2761 = vmatprep.subr.bf16.mxu0 %v3725_v57  ;;  %v3804_v56 = vld [vmem:[%s5035_s4 + $0x6e8] ss:$16 sps:$4 sm:$0xff]   ;;  %v3809_v57 = vld [vmem:[%s5035_s4 + $0x704] ss:$16 sps:$4 sm:$0xff]  }
 0x1ab   : > { %2925 = vmatprep.subr.bf16.mxu1 %v3728_v58  ;;  %v3812_v58 = vld [vmem:[%s5035_s4 + $0x70c] ss:$16 sps:$4 sm:$0xff]  }
 0x1ad   : > { %2762 = vmatpush1.bf16.msra.mxu0 %v3723_v60  ;;  %v3807_v60 = vld [vmem:[%s5035_s4 + $0x700] ss:$16 sps:$4 sm:$0xff]  }
 0x1ae   : > { %2926 = vmatpush1.bf16.msra.mxu1 %v3726_v61  ;;  %2763 = vmatprep.subr.bf16.mxu0 %v3731_v62  ;;  %v3810_v61 = vld [vmem:[%s5035_s4 + $0x708] ss:$16 sps:$4 sm:$0xff]   ;;  %v3815_v62 = vld [vmem:[%s5035_s4 + $0x724] ss:$16 sps:$4 sm:$0xff]  }
 0x1af   : > { %2927 = vmatprep.subr.bf16.mxu1 %v3734_v63  ;;  %v3818_v63 = vld [vmem:[%s5035_s4 + $0x72c] ss:$16 sps:$4 sm:$0xff]  }
 0x1b1   : > { %2764 = vmatpush1.bf16.msra.mxu0 %v3729_v0  ;;  %v3813_v0 = vld [vmem:[%s5035_s4 + $0x720] ss:$16 sps:$4 sm:$0xff]  }
 0x1b2   : > { %2928 = vmatpush1.bf16.msra.mxu1 %v3732_v32  ;;  %2765 = vmatprep.subr.bf16.mxu0 %v3737_v8  ;;  %v3816_v32 = vld [vmem:[%s5035_s4 + $0x728] ss:$16 sps:$4 sm:$0xff]   ;;  %v3821_v8 = vld [vmem:[%s5035_s4 + $0x744] ss:$16 sps:$4 sm:$0xff]  }
 0x1b3   : > { %2929 = vmatprep.subr.bf16.mxu1 %v3740_v10  ;;  %v3824_v10 = vld [vmem:[%s5035_s4 + $0x74c] ss:$16 sps:$4 sm:$0xff]  }
 0x1b5   : > { %2766 = vmatpush1.bf16.msra.mxu0 %v3735_v6  ;;  %v3819_v6 = vld [vmem:[%s5035_s4 + $0x740] ss:$16 sps:$4 sm:$0xff]  }
 0x1b6   : > { %2930 = vmatpush1.bf16.msra.mxu1 %v3738_v11  ;;  %2767 = vmatprep.subr.bf16.mxu0 %v3743_v36  ;;  %v3822_v11 = vld [vmem:[%s5035_s4 + $0x748] ss:$16 sps:$4 sm:$0xff]   ;;  %v3827_v36 = vld [vmem:[%s5035_s4 + $0x764] ss:$16 sps:$4 sm:$0xff]  }
 0x1b7   : > { %2931 = vmatprep.subr.bf16.mxu1 %v3746_v1  ;;  %v3830_v1 = vld [vmem:[%s5035_s4 + $0x76c] ss:$16 sps:$4 sm:$0xff]  }
 0x1b9   : > { %2768 = vmatpush1.bf16.msra.mxu0 %v3741_v12  ;;  %v3825_v12 = vld [vmem:[%s5035_s4 + $0x760] ss:$16 sps:$4 sm:$0xff]  }
 0x1ba   : > { %2932 = vmatpush1.bf16.msra.mxu1 %v3744_v2  ;;  %2769 = vmatprep.subr.bf16.mxu0 %v3749_v3  ;;  %v3828_v2 = vld [vmem:[%s5035_s4 + $0x768] ss:$16 sps:$4 sm:$0xff]   ;;  %v3833_v3 = vld [vmem:[%s5035_s4 + $0x784] ss:$16 sps:$4 sm:$0xff]  }
 0x1bb   : > { %2933 = vmatprep.subr.bf16.mxu1 %v3752_v13  ;;  %v3836_v13 = vld [vmem:[%s5035_s4 + $0x78c] ss:$16 sps:$4 sm:$0xff]  }
 0x1bd   : > { %2770 = vmatpush1.bf16.msra.mxu0 %v3747_v14  ;;  %v3831_v14 = vld [vmem:[%s5035_s4 + $0x780] ss:$16 sps:$4 sm:$0xff]  }
 0x1be   : > { %2934 = vmatpush1.bf16.msra.mxu1 %v3750_v15  ;;  %2771 = vmatprep.subr.bf16.mxu0 %v3755_v9  ;;  %v3834_v15 = vld [vmem:[%s5035_s4 + $0x788] ss:$16 sps:$4 sm:$0xff]   ;;  %v3839_v9 = vld [vmem:[%s5035_s4 + $0x7a4] ss:$16 sps:$4 sm:$0xff]  }
 0x1bf   : > { %2935 = vmatprep.subr.bf16.mxu1 %v3758_v16  ;;  %v3842_v16 = vld [vmem:[%s5035_s4 + $0x7ac] ss:$16 sps:$4 sm:$0xff]  }
 0x1c1   : > { %2772 = vmatpush1.bf16.msra.mxu0 %v3753_v17  ;;  %v3837_v17 = vld [vmem:[%s5035_s4 + $0x7a0] ss:$16 sps:$4 sm:$0xff]  }
 0x1c2   : > { %2936 = vmatpush1.bf16.msra.mxu1 %v3756_v34  ;;  %2782 = vmatprep.subr.bf16.mxu0 %v3761_v19  ;;  %v3840_v34 = vld [vmem:[%s5035_s4 + $0x7a8] ss:$16 sps:$4 sm:$0xff]   ;;  %v3848_v19 = vld [vmem:[%s5035_s4 + $0x7cc] ss:$16 sps:$4 sm:$0xff]  }
 0x1c3   : > { %2946 = vmatprep.subr.bf16.mxu1 %v3764_v20  ;;  %v3843_v20 = vld [vmem:[%s5035_s4 + $0x7c0] ss:$16 sps:$4 sm:$0xff]  }
 0x1c4   : > { %2774 = vmatmul.mubr.bf16.vlgmr.msra.gmra.mrb[8].mxu0 %v1119_v23 }
 0x1c5   : > { %2938 = vmatmul.mubr.bf16.vlgmr.msra.gmra.mrb[8].mxu1 %v1119_v23  ;;  %2783 = vmatpush1.bf16.msra.mxu0 %v3759_v22  ;;  %v3851_v22 = vld [vmem:[%s5035_s4 + $0x7e4] ss:$16 sps:$4 sm:$0xff]   ;;  %v3854_v23 = vld [vmem:[%s5035_s4 + $0x7ec] ss:$16 sps:$4 sm:$0xff]  }
 0x1c6   : > { %2814 = vmatprep.mubr.bf16.mxu0 %v1122_v25  ;;  %2947 = vmatpush1.bf16.msra.mxu1 %v3762_v31  ;;  %v3849_v31 = vld [vmem:[%s5035_s4 + $0x7e0] ss:$16 sps:$4 sm:$0xff]  }
 0x1c7   : > { %2978 = vmatprep.mubr.bf16.mxu1 %v1122_v25  ;;  %2784 = vmatprep.subr.bf16.mxu0 %v3767_v24  ;;  %v3852_v24 = vld [vmem:[%s5035_s4 + $0x7e8] ss:$16 sps:$4 sm:$0xff]   ;;  %v1102_v25 = vrot.slane %v4426_v59, %v4390_v33 }
 0x1c8   : > { %2948 = vmatprep.subr.bf16.mxu1 %v3770_v35 }
 0x1c9   : > { %2785 = vmatpush1.bf16.msra.mxu0 %v3765_v26  ;;  %v1121_v35 = vpack.c.bf16 %v1102_v25, %v1102_v25 }
 0x1ca   : > { %2949 = vmatpush1.bf16.msra.mxu1 %v3768_v28  ;;  %2786 = vmatprep.subr.bf16.mxu0 %v3773_v29 }
 0x1cb   : > { %2950 = vmatprep.subr.bf16.mxu1 %v3776_v30 }
 0x1cd   : > { %2787 = vmatpush1.bf16.msra.mxu0 %v3771_v37 }
 0x1ce   : > { %2951 = vmatpush1.bf16.msra.mxu1 %v3774_v38  ;;  %2788 = vmatprep.subr.bf16.mxu0 %v3779_v39 }
 0x1cf   : > { %2952 = vmatprep.subr.bf16.mxu1 %v3782_v40 }
 0x1d1   : > { %2789 = vmatpush1.bf16.msra.mxu0 %v3777_v41 }
 0x1d2   : > { %2953 = vmatpush1.bf16.msra.mxu1 %v3780_v5  ;;  %2790 = vmatprep.subr.bf16.mxu0 %v3785_v42 }
 0x1d3   : > { %2954 = vmatprep.subr.bf16.mxu1 %v3788_v43 }
 0x1d5   : > { %2791 = vmatpush1.bf16.msra.mxu0 %v3783_v44 }
 0x1d6   : > { %2955 = vmatpush1.bf16.msra.mxu1 %v3786_v45  ;;  %2792 = vmatprep.subr.bf16.mxu0 %v3791_v46 }
 0x1d7   : > { %2956 = vmatprep.subr.bf16.mxu1 %v3794_v47 }
 0x1d9   : > { %2793 = vmatpush1.bf16.msra.mxu0 %v3789_v48 }
 0x1da   : > { %2957 = vmatpush1.bf16.msra.mxu1 %v3792_v49  ;;  %2794 = vmatprep.subr.bf16.mxu0 %v3797_v50 }
 0x1db   : > { %2958 = vmatprep.subr.bf16.mxu1 %v3800_v51 }
 0x1dd   : > { %2795 = vmatpush1.bf16.msra.mxu0 %v3795_v52 }
 0x1de   : > { %2959 = vmatpush1.bf16.msra.mxu1 %v3798_v53  ;;  %2796 = vmatprep.subr.bf16.mxu0 %v3803_v7 }
 0x1df   : > { %2960 = vmatprep.subr.bf16.mxu1 %v3806_v54 }
 0x1e1   : > { %2797 = vmatpush1.bf16.msra.mxu0 %v3801_v55 }
 0x1e2   : > { %2961 = vmatpush1.bf16.msra.mxu1 %v3804_v56  ;;  %2798 = vmatprep.subr.bf16.mxu0 %v3809_v57 }
 0x1e3   : > { %2962 = vmatprep.subr.bf16.mxu1 %v3812_v58 }
 0x1e5   : > { %2799 = vmatpush1.bf16.msra.mxu0 %v3807_v60 }
 0x1e6   : > { %2963 = vmatpush1.bf16.msra.mxu1 %v3810_v61  ;;  %2800 = vmatprep.subr.bf16.mxu0 %v3815_v62 }
 0x1e7   : > { %2964 = vmatprep.subr.bf16.mxu1 %v3818_v63 }
 0x1e9   : > { %2801 = vmatpush1.bf16.msra.mxu0 %v3813_v0 }
 0x1ea   : > { %2965 = vmatpush1.bf16.msra.mxu1 %v3816_v32  ;;  %2802 = vmatprep.subr.bf16.mxu0 %v3821_v8 }
 0x1eb   : > { %2966 = vmatprep.subr.bf16.mxu1 %v3824_v10 }
 0x1ed   : > { %2803 = vmatpush1.bf16.msra.mxu0 %v3819_v6 }
 0x1ee   : > { %2967 = vmatpush1.bf16.msra.mxu1 %v3822_v11  ;;  %2804 = vmatprep.subr.bf16.mxu0 %v3827_v36 }
 0x1ef   : > { %2968 = vmatprep.subr.bf16.mxu1 %v3830_v1 }
 0x1f1   : > { %2805 = vmatpush1.bf16.msra.mxu0 %v3825_v12 }
 0x1f2   : > { %2969 = vmatpush1.bf16.msra.mxu1 %v3828_v2  ;;  %2806 = vmatprep.subr.bf16.mxu0 %v3833_v3 }
 0x1f3   : > { %2970 = vmatprep.subr.bf16.mxu1 %v3836_v13 }
 0x1f5   : > { %2807 = vmatpush1.bf16.msra.mxu0 %v3831_v14 }
 0x1f6   : > { %2971 = vmatpush1.bf16.msra.mxu1 %v3834_v15  ;;  %2808 = vmatprep.subr.bf16.mxu0 %v3839_v9 }
 0x1f7   : > { %2972 = vmatprep.subr.bf16.mxu1 %v3842_v16 }
 0x1f9   : > { %2809 = vmatpush1.bf16.msra.mxu0 %v3837_v17 }
 0x1fa   : > { %2973 = vmatpush1.bf16.msra.mxu1 %v3840_v34  ;;  %2810 = vmatprep.subr.bf16.mxu0 %v3845_v18 }
 0x1fb   : > { %2974 = vmatprep.subr.bf16.mxu1 %v3848_v19 }
 0x1fd   : > { %2811 = vmatpush1.bf16.msra.mxu0 %v3843_v20 }
 0x1fe   : > { %2975 = vmatpush1.bf16.msra.mxu1 %v3846_v21  ;;  %2812 = vmatprep.subr.bf16.mxu0 %v3851_v22 }
 0x1ff   : > { %2976 = vmatprep.subr.bf16.mxu1 %v3854_v23 }
 0x201   : > { %2813 = vmatpush1.bf16.msra.mxu0 %v3849_v31 }
 0x202   : > { %2977 = vmatpush1.bf16.msra.mxu1 %v3852_v24 }
 0x204   : > { %2815 = vmatmul.mubr.bf16.vlgmr.msra.gmra.mrb[8].mxu0 %v1121_v35 }
 0x205   : > { %2979 = vmatmul.mubr.bf16.vlgmr.msra.gmra.mrb[8].mxu1 %v1121_v35 }
 0x2d7   : > { %v2816_v26 = vpop.f32.mrb[8].mxu0 }
 0x2d8   : > { %v2980_v28 = vpop.f32.mrb[8].mxu1  ;;  %v2818_v29 = vpop.f32.mrb[9].mxu0 }
 0x2d9   : > { %v2991_v30 = vcombine.low %v2816_v26, %v2818_v29  ;;  %v2982_v37 = vpop.f32.mrb[9].mxu1  ;;  %v2820_v38 = vpop.f32.mrb[10].mxu0 }
 0x2da   : > { %v2992_v39 = vcombine.low %v2980_v28, %v2982_v37  ;;  %v2984_v40 = vpop.f32.mrb[10].mxu1  ;;  %v2821_v41 = vpop.f32.mrb[11].mxu0 }
 0x2db   : > { %v2999_v5 = vrot.slane %v2991_v30, %v4381_v27  ;;  %v2985_v42 = vpop.f32.mrb[11].mxu1 }
 0x2dc   : > { %v3006_v33 = vrot.slane %v2992_v39, %v4381_v27 }
 0x2de   : > { %v3007_v59 = vcombine.low %v2999_v5, %v3006_v33 }
 0x2e0   : > { %v3014_v43 = vrot.slane %v3007_v59, %v4381_v27 }
 0x2e2   : > { %3020 = vst.msk [vmem:[%s250_s24] sm:$0xf] %vm3018_vm0, %v3014_v43 }
 0x2e3 PF: > { %s15_s20 = sadd.s32 1, %s3877_s20   ;;  %s5037_s18 = smov %s3873_s19 }
 0x2e4   : > { %p12_p5 = scmp.ge.s32.totalorder %s15_s20, 4   ;;  %s5038_s19 = smov %s5040_s21 }
 0x2e6   :  { %14 = sbr.rel (!%p12_p5) target bundleno = 2 (0x2), region = 78 }

</bundles_post_ra>
